<compile_context>
chip_gen: v5e
topology: v5e:2x2
jax: 0.10.0
libtpu: 0.0.40
codegen_flags: <defaults>
</compile_context>

<pallas_src>
import functools

import numpy as np
import jax
import jax.numpy as jnp
from jax.experimental import pallas as pl
from jax.experimental.pallas import tpu as pltpu


def ncf_kernel(flat_ref,
               w1_ref, b1_ref, s1_ref, t1_ref,
               w2_ref, b2_ref, s2_ref, t2_ref,
               wg_ref, wh_ref, bfc_ref,
               out_ref, *, embed_dim):
    E = embed_dim
    flat = flat_ref[...]                                    # (tb, F*E)

    # ---- GMF branch: user emb = lanes [0,E), item emb = lanes [E,2E) ----
    gmf = flat[:, :E] * flat[:, E:2 * E]                    # (tb, E)

    # ---- MLP branch: Linear -> BN(eval scale/shift) -> ReLU, twice ----
    h = jnp.dot(flat, w1_ref[...],
                preferred_element_type=jnp.float32) + b1_ref[...]
    h = jnp.maximum(h * s1_ref[...] + t1_ref[...], 0.0)     # (tb, H1)

    h = jnp.dot(h, w2_ref[...],
                preferred_element_type=jnp.float32) + b2_ref[...]
    h = jnp.maximum(h * s2_ref[...] + t2_ref[...], 0.0)     # (tb, H2)

    # ---- final fc over concat([gmf, h]), emitted lane-dense as (1, tb) ----
    #   out_row = wg_row @ gmf^T + wh_row @ h^T + bias
    out_ref[...] = (
        jnp.dot(wg_ref[...], gmf.T, preferred_element_type=jnp.float32)
        + jnp.dot(wh_ref[...], h.T, preferred_element_type=jnp.float32)
        + bfc_ref[...])                                     # (1, tb)


def ncf_forward(x_idx, params, *, tb=512):
    """x_idx: (B, num_fields) int32 categorical field indices."""
    assert tb % 128 == 0, "tb must be a multiple of 128 (lane-dense output)"
    offsets = params["offsets"]                             # (F,) int32
    table = params["emb_table"]                             # (sum(field_dims), E)
    B, F = x_idx.shape
    E = table.shape[1]
    FE = F * E
    H1 = params["w1"].shape[1]
    H2 = params["w2"].shape[1]

    # Embedding lookup (glue, plain XLA gather) -> single flat activation stream.
    emb = jnp.take(table, x_idx + offsets[None, :], axis=0)  # (B, F, E)
    flat_x = emb.reshape(B, FE)                              # (B, F*E)

    # Pad ragged batches up to a tile multiple (padded rows are ignored).
    Bp = ((B + tb - 1) // tb) * tb
    if Bp != B:
        flat_x = jnp.pad(flat_x, ((0, Bp - B), (0, 0)))
    grid = (Bp // tb,)

    # Final fc weight rows (host-side transpose of the (K,1) columns).
    wg_row = params["wg"].T                                  # (1, E)
    wh_row = params["wh"].T                                  # (1, H2)

    batch_spec = pl.BlockSpec((tb, FE), lambda i: (i, 0))
    fixed_spec = lambda shape: pl.BlockSpec(shape, lambda i: (0, 0))

    out = pl.pallas_call(
        functools.partial(ncf_kernel, embed_dim=E),
        out_shape=jax.ShapeDtypeStruct((1, Bp), jnp.float32),
        grid_spec=pltpu.PrefetchScalarGridSpec(
            num_scalar_prefetch=0,
            grid=grid,
            in_specs=[
                batch_spec,                   # flat embeddings (only batch-tiled input)
                fixed_spec((FE, H1)),         # w1
                fixed_spec((1, H1)),          # b1
                fixed_spec((1, H1)),          # bn1 scale
                fixed_spec((1, H1)),          # bn1 shift
                fixed_spec((H1, H2)),         # w2
                fixed_spec((1, H2)),          # b2
                fixed_spec((1, H2)),          # bn2 scale
                fixed_spec((1, H2)),          # bn2 shift
                fixed_spec((1, E)),           # fc weight row, gmf part
                fixed_spec((1, H2)),          # fc weight row, mlp part
                fixed_spec((1, 1)),           # fc bias
            ],
            out_specs=pl.BlockSpec((1, tb), lambda i: (0, i)),
        ),
        compiler_params=pltpu.CompilerParams(
            dimension_semantics=("parallel",)),
    )(flat_x,
      params["w1"], params["b1"], params["s1"], params["t1"],
      params["w2"], params["b2"], params["s2"], params["t2"],
      wg_row, wh_row, params["bfc"])

    return out[0, :B]                                        # (B,)  == .squeeze(1)


def make_params(key, field_dims, embed_dim, mlp_dims):
    """Deterministic synthetic parameters mirroring the PyTorch module's shapes."""
    ks = jax.random.split(key, 16)
    n_emb = int(np.sum(field_dims))
    F = len(field_dims)
    FE = F * embed_dim
    H1, H2 = mlp_dims
    eps = 1e-5

    def uniform(k, shape, bound):
        return jax.random.uniform(k, shape, jnp.float32, -bound, bound)

    # embedding table: xavier_uniform
    xb = float(np.sqrt(6.0 / (n_emb + embed_dim)))
    emb_table = uniform(ks[0], (n_emb, embed_dim), xb)

    # Linear layers (stored as (in, out)); PyTorch-default-ish uniform bound
    w1 = uniform(ks[1], (FE, H1), 1.0 / np.sqrt(FE))
    b1 = uniform(ks[2], (1, H1), 1.0 / np.sqrt(FE))
    w2 = uniform(ks[3], (H1, H2), 1.0 / np.sqrt(H1))
    b2 = uniform(ks[4], (1, H2), 1.0 / np.sqrt(H1))

    # BatchNorm1d params + running stats, folded to scale/shift (eval mode)
    def bn_fold(kg, kb, km, kv, n):
        gamma = 1.0 + 0.1 * jax.random.normal(kg, (1, n), jnp.float32)
        beta = 0.1 * jax.random.normal(kb, (1, n), jnp.float32)
        rmean = 0.1 * jax.random.normal(km, (1, n), jnp.float32)
        rvar = jax.random.uniform(kv, (1, n), jnp.float32, 0.5, 1.5)
        scale = gamma / jnp.sqrt(rvar + eps)
        shift = beta - rmean * scale
        return scale, shift

    s1, t1 = bn_fold(ks[5], ks[6], ks[7], ks[8], H1)
    s2, t2 = bn_fold(ks[9], ks[10], ks[11], ks[12], H2)

    # final fc: Linear(embed_dim + H2, 1), split into gmf part and mlp part
    fan_in = embed_dim + H2
    wfc = uniform(ks[13], (fan_in, 1), 1.0 / np.sqrt(fan_in))
    bfc = uniform(ks[14], (1, 1), 1.0 / np.sqrt(fan_in))
    wg, wh = wfc[:embed_dim], wfc[embed_dim:]

    offsets = jnp.asarray(
        np.array((0, *np.cumsum(field_dims)[:-1]), dtype=np.int32))

    return dict(emb_table=emb_table, offsets=offsets,
                w1=w1, b1=b1, s1=s1, t1=t1,
                w2=w2, b2=b2, s2=s2, t2=t2,
                wg=wg, wh=wh, bfc=bfc)


def ncf_reference(x_idx, params):
    """Pure-JAX reference for correctness checking (mirrors the PyTorch forward)."""
    emb = jnp.take(params["emb_table"],
                   x_idx + params["offsets"][None, :], axis=0)
    user_x, item_x = emb[:, 0, :], emb[:, 1, :]
    gmf = user_x * item_x
    B = x_idx.shape[0]
    h = emb.reshape(B, -1) @ params["w1"] + params["b1"]
    h = jnp.maximum(h * params["s1"] + params["t1"], 0.0)
    h = h @ params["w2"] + params["b2"]
    h = jnp.maximum(h * params["s2"] + params["t2"], 0.0)
    out = gmf @ params["wg"] + h @ params["wh"] + params["bfc"]
    return out[:, 0]


if __name__ == "__main__":
    key = jax.random.PRNGKey(0)
    k_param, k_user, k_item = jax.random.split(key, 3)

    field_dims = np.array([10, 20], dtype=np.int64)   # (user vocab, item vocab)
    embed_dim = 16
    mlp_dims = (32, 16)
    batch = 1024        # 2 grid steps of tb=512 -> both v7x TensorCores busy

    params = make_params(k_param, field_dims, embed_dim, mlp_dims)

    user_idx = jax.random.randint(k_user, (batch, 1), 0, int(field_dims[0]), jnp.int32)
    item_idx = jax.random.randint(k_item, (batch, 1), 0, int(field_dims[1]), jnp.int32)
    x_idx = jnp.concatenate([user_idx, item_idx], axis=1)     # (B, 2) int32

    out = ncf_forward(x_idx, params, tb=512)
    jax.block_until_ready(out)

    ref = ncf_reference(x_idx, params)
    assert out.shape == (batch,)
    np.testing.assert_allclose(np.asarray(out), np.asarray(ref),
                               rtol=1e-5, atol=1e-5)

    # Ragged batch exercises the pad-and-slice path (same compiled block shapes).
    out_r = ncf_forward(x_idx[:1000], params, tb=512)
    jax.block_until_ready(out_r)
    np.testing.assert_allclose(np.asarray(out_r), np.asarray(ref)[:1000],
                               rtol=1e-5, atol=1e-5)

    print("KERNEL_OK")
</pallas_src>

<mosaic_0001>
module attributes {stable_mosaic.version = 11 : i64} {
  func.func @ncf_kernel(%arg0: i32, %arg1: memref<512x32xf32, #tpu.memory_space<vmem>>, %arg2: memref<32x32xf32, #tpu.memory_space<vmem>>, %arg3: memref<1x32xf32, #tpu.memory_space<vmem>>, %arg4: memref<1x32xf32, #tpu.memory_space<vmem>>, %arg5: memref<1x32xf32, #tpu.memory_space<vmem>>, %arg6: memref<32x16xf32, #tpu.memory_space<vmem>>, %arg7: memref<1x16xf32, #tpu.memory_space<vmem>>, %arg8: memref<1x16xf32, #tpu.memory_space<vmem>>, %arg9: memref<1x16xf32, #tpu.memory_space<vmem>>, %arg10: memref<1x16xf32, #tpu.memory_space<vmem>>, %arg11: memref<1x16xf32, #tpu.memory_space<vmem>>, %arg12: memref<1x1xf32, #tpu.memory_space<vmem>>, %arg13: memref<1x512xf32, #tpu.memory_space<vmem>>) attributes {dimension_semantics = [#tpu.dimension_semantics<parallel>], iteration_bounds = array<i64: 2>, scalar_prefetch = 0 : i64, scratch_operands = 0 : i64, tpu.core_type = #tpu.core_type<tc>, window_params = [{transform_indices = @transform_0, window_bounds = array<i64: 512, 32>}, {pipeline_mode = #tpu.pipeline_mode<synchronous>, transform_indices = @transform_1, window_bounds = array<i64: 32, 32>}, {pipeline_mode = #tpu.pipeline_mode<synchronous>, transform_indices = @transform_2, window_bounds = array<i64: 1, 32>}, {pipeline_mode = #tpu.pipeline_mode<synchronous>, transform_indices = @transform_3, window_bounds = array<i64: 1, 32>}, {pipeline_mode = #tpu.pipeline_mode<synchronous>, transform_indices = @transform_4, window_bounds = array<i64: 1, 32>}, {pipeline_mode = #tpu.pipeline_mode<synchronous>, transform_indices = @transform_5, window_bounds = array<i64: 32, 16>}, {pipeline_mode = #tpu.pipeline_mode<synchronous>, transform_indices = @transform_6, window_bounds = array<i64: 1, 16>}, {pipeline_mode = #tpu.pipeline_mode<synchronous>, transform_indices = @transform_7, window_bounds = array<i64: 1, 16>}, {pipeline_mode = #tpu.pipeline_mode<synchronous>, transform_indices = @transform_8, window_bounds = array<i64: 1, 16>}, {pipeline_mode = #tpu.pipeline_mode<synchronous>, transform_indices = @transform_9, window_bounds = array<i64: 1, 16>}, {pipeline_mode = #tpu.pipeline_mode<synchronous>, transform_indices = @transform_10, window_bounds = array<i64: 1, 16>}, {pipeline_mode = #tpu.pipeline_mode<synchronous>, transform_indices = @transform_11, window_bounds = array<i64: 1, 1>}, {transform_indices = @transform_12, window_bounds = array<i64: 1, 512>}]} {
    %c0 = arith.constant 0 : index
    %c0_0 = arith.constant 0 : index
    %0 = vector.load %arg1[%c0, %c0_0] : memref<512x32xf32, #tpu.memory_space<vmem>>, vector<512x32xf32>
    %1 = vector.extract_strided_slice %0 {offsets = [0, 0], sizes = [512, 16], strides = [1, 1]} : vector<512x32xf32> to vector<512x16xf32>
    %2 = vector.extract_strided_slice %0 {offsets = [0, 16], sizes = [512, 16], strides = [1, 1]} : vector<512x32xf32> to vector<512x16xf32>
    %3 = arith.mulf %1, %2 : vector<512x16xf32>
    %c0_1 = arith.constant 0 : index
    %c0_2 = arith.constant 0 : index
    %4 = vector.load %arg2[%c0_1, %c0_2] : memref<32x32xf32, #tpu.memory_space<vmem>>, vector<32x32xf32>
    %cst = arith.constant dense<0.000000e+00> : vector<512x32xf32>
    %5 = tpu.matmul %0, %4, %cst {dimension_numbers = #tpu.dot_dimension_numbers<[1], [0], [0], [1], [0, 0, 1, 1], [], []>} : vector<512x32xf32>, vector<32x32xf32>, vector<512x32xf32> -> vector<512x32xf32>
    %c0_3 = arith.constant 0 : index
    %c0_4 = arith.constant 0 : index
    %6 = vector.load %arg3[%c0_3, %c0_4] : memref<1x32xf32, #tpu.memory_space<vmem>>, vector<1x32xf32>
    %7 = vector.broadcast %6 : vector<1x32xf32> to vector<512x32xf32>
    %8 = arith.addf %5, %7 : vector<512x32xf32>
    %c0_5 = arith.constant 0 : index
    %c0_6 = arith.constant 0 : index
    %9 = vector.load %arg4[%c0_5, %c0_6] : memref<1x32xf32, #tpu.memory_space<vmem>>, vector<1x32xf32>
    %10 = vector.broadcast %9 : vector<1x32xf32> to vector<512x32xf32>
    %11 = arith.mulf %8, %10 : vector<512x32xf32>
    %c0_7 = arith.constant 0 : index
    %c0_8 = arith.constant 0 : index
    %12 = vector.load %arg5[%c0_7, %c0_8] : memref<1x32xf32, #tpu.memory_space<vmem>>, vector<1x32xf32>
    %13 = vector.broadcast %12 : vector<1x32xf32> to vector<512x32xf32>
    %14 = arith.addf %11, %13 : vector<512x32xf32>
    %cst_9 = arith.constant 0.000000e+00 : f32
    %15 = vector.broadcast %cst_9 : f32 to vector<512x32xf32>
    %16 = arith.maximumf %14, %15 : vector<512x32xf32>
    %c0_10 = arith.constant 0 : index
    %c0_11 = arith.constant 0 : index
    %17 = vector.load %arg6[%c0_10, %c0_11] : memref<32x16xf32, #tpu.memory_space<vmem>>, vector<32x16xf32>
    %cst_12 = arith.constant dense<0.000000e+00> : vector<512x16xf32>
    %18 = tpu.matmul %16, %17, %cst_12 {dimension_numbers = #tpu.dot_dimension_numbers<[1], [0], [0], [1], [0, 0, 1, 1], [], []>} : vector<512x32xf32>, vector<32x16xf32>, vector<512x16xf32> -> vector<512x16xf32>
    %c0_13 = arith.constant 0 : index
    %c0_14 = arith.constant 0 : index
    %19 = vector.load %arg7[%c0_13, %c0_14] : memref<1x16xf32, #tpu.memory_space<vmem>>, vector<1x16xf32>
    %20 = vector.broadcast %19 : vector<1x16xf32> to vector<512x16xf32>
    %21 = arith.addf %18, %20 : vector<512x16xf32>
    %c0_15 = arith.constant 0 : index
    %c0_16 = arith.constant 0 : index
    %22 = vector.load %arg8[%c0_15, %c0_16] : memref<1x16xf32, #tpu.memory_space<vmem>>, vector<1x16xf32>
    %23 = vector.broadcast %22 : vector<1x16xf32> to vector<512x16xf32>
    %24 = arith.mulf %21, %23 : vector<512x16xf32>
    %c0_17 = arith.constant 0 : index
    %c0_18 = arith.constant 0 : index
    %25 = vector.load %arg9[%c0_17, %c0_18] : memref<1x16xf32, #tpu.memory_space<vmem>>, vector<1x16xf32>
    %26 = vector.broadcast %25 : vector<1x16xf32> to vector<512x16xf32>
    %27 = arith.addf %24, %26 : vector<512x16xf32>
    %cst_19 = arith.constant 0.000000e+00 : f32
    %28 = vector.broadcast %cst_19 : f32 to vector<512x16xf32>
    %29 = arith.maximumf %27, %28 : vector<512x16xf32>
    %c0_20 = arith.constant 0 : index
    %c0_21 = arith.constant 0 : index
    %30 = vector.load %arg10[%c0_20, %c0_21] : memref<1x16xf32, #tpu.memory_space<vmem>>, vector<1x16xf32>
    %31 = tpu.transpose %3, [1, 0] : vector<512x16xf32> -> vector<16x512xf32>
    %cst_22 = arith.constant dense<0.000000e+00> : vector<1x512xf32>
    %32 = tpu.matmul %30, %31, %cst_22 {dimension_numbers = #tpu.dot_dimension_numbers<[1], [0], [0], [1], [0, 0, 1, 1], [], []>} : vector<1x16xf32>, vector<16x512xf32>, vector<1x512xf32> -> vector<1x512xf32>
    %c0_23 = arith.constant 0 : index
    %c0_24 = arith.constant 0 : index
    %33 = vector.load %arg11[%c0_23, %c0_24] : memref<1x16xf32, #tpu.memory_space<vmem>>, vector<1x16xf32>
    %34 = tpu.transpose %29, [1, 0] : vector<512x16xf32> -> vector<16x512xf32>
    %cst_25 = arith.constant dense<0.000000e+00> : vector<1x512xf32>
    %35 = tpu.matmul %33, %34, %cst_25 {dimension_numbers = #tpu.dot_dimension_numbers<[1], [0], [0], [1], [0, 0, 1, 1], [], []>} : vector<1x16xf32>, vector<16x512xf32>, vector<1x512xf32> -> vector<1x512xf32>
    %36 = arith.addf %32, %35 : vector<1x512xf32>
    %c0_26 = arith.constant 0 : index
    %c0_27 = arith.constant 0 : index
    %37 = vector.load %arg12[%c0_26, %c0_27] : memref<1x1xf32, #tpu.memory_space<vmem>>, vector<1x1xf32>
    %38 = vector.broadcast %37 : vector<1x1xf32> to vector<1x512xf32>
    %39 = arith.addf %36, %38 : vector<1x512xf32>
    %c0_28 = arith.constant 0 : index
    %c0_29 = arith.constant 0 : index
    %40 = vector.load %arg13[%c0_28, %c0_29] : memref<1x512xf32, #tpu.memory_space<vmem>>, vector<1x512xf32>
    tpu.vector_store %arg13[%c0_28, %c0_29], %39 {strides = array<i32>} : memref<1x512xf32, #tpu.memory_space<vmem>>, vector<1x512xf32>,
    return
  }
  func.func @transform_0(%arg0: i32) -> (i32, i32) {
    %c0_i32 = arith.constant 0 : i32
    %c0_i32_0 = arith.constant 0 : i32
    return %arg0, %c0_i32 : i32, i32
  }
  func.func @transform_1(%arg0: i32) -> (i32, i32) {
    %c0_i32 = arith.constant 0 : i32
    %c0_i32_0 = arith.constant 0 : i32
    %c0_i32_1 = arith.constant 0 : i32
    return %c0_i32, %c0_i32_0 : i32, i32
  }
  func.func @transform_2(%arg0: i32) -> (i32, i32) {
    %c0_i32 = arith.constant 0 : i32
    %c0_i32_0 = arith.constant 0 : i32
    %c0_i32_1 = arith.constant 0 : i32
    return %c0_i32, %c0_i32_0 : i32, i32
  }
  func.func @transform_3(%arg0: i32) -> (i32, i32) {
    %c0_i32 = arith.constant 0 : i32
    %c0_i32_0 = arith.constant 0 : i32
    %c0_i32_1 = arith.constant 0 : i32
    return %c0_i32, %c0_i32_0 : i32, i32
  }
  func.func @transform_4(%arg0: i32) -> (i32, i32) {
    %c0_i32 = arith.constant 0 : i32
    %c0_i32_0 = arith.constant 0 : i32
    %c0_i32_1 = arith.constant 0 : i32
    return %c0_i32, %c0_i32_0 : i32, i32
  }
  func.func @transform_5(%arg0: i32) -> (i32, i32) {
    %c0_i32 = arith.constant 0 : i32
    %c0_i32_0 = arith.constant 0 : i32
    %c0_i32_1 = arith.constant 0 : i32
    return %c0_i32, %c0_i32_0 : i32, i32
  }
  func.func @transform_6(%arg0: i32) -> (i32, i32) {
    %c0_i32 = arith.constant 0 : i32
    %c0_i32_0 = arith.constant 0 : i32
    %c0_i32_1 = arith.constant 0 : i32
    return %c0_i32, %c0_i32_0 : i32, i32
  }
  func.func @transform_7(%arg0: i32) -> (i32, i32) {
    %c0_i32 = arith.constant 0 : i32
    %c0_i32_0 = arith.constant 0 : i32
    %c0_i32_1 = arith.constant 0 : i32
    return %c0_i32, %c0_i32_0 : i32, i32
  }
  func.func @transform_8(%arg0: i32) -> (i32, i32) {
    %c0_i32 = arith.constant 0 : i32
    %c0_i32_0 = arith.constant 0 : i32
    %c0_i32_1 = arith.constant 0 : i32
    return %c0_i32, %c0_i32_0 : i32, i32
  }
  func.func @transform_9(%arg0: i32) -> (i32, i32) {
    %c0_i32 = arith.constant 0 : i32
    %c0_i32_0 = arith.constant 0 : i32
    %c0_i32_1 = arith.constant 0 : i32
    return %c0_i32, %c0_i32_0 : i32, i32
  }
  func.func @transform_10(%arg0: i32) -> (i32, i32) {
    %c0_i32 = arith.constant 0 : i32
    %c0_i32_0 = arith.constant 0 : i32
    %c0_i32_1 = arith.constant 0 : i32
    return %c0_i32, %c0_i32_0 : i32, i32
  }
  func.func @transform_11(%arg0: i32) -> (i32, i32) {
    %c0_i32 = arith.constant 0 : i32
    %c0_i32_0 = arith.constant 0 : i32
    %c0_i32_1 = arith.constant 0 : i32
    return %c0_i32, %c0_i32_0 : i32, i32
  }
  func.func @transform_12(%arg0: i32) -> (i32, i32) {
    %c0_i32 = arith.constant 0 : i32
    %c0_i32_0 = arith.constant 0 : i32
    return %c0_i32, %arg0 : i32, i32
  }
}

</mosaic_0001>

<bundles_post_ra>
// kernel: tpu_custom_call.1
= control target key start
LH: loop header
LB: loop body
LE: loop exit
PB: predicated region body
PF: predicated region fallthrough
CT: control target
= control target key end

     0   :  { %s4714_s0 = inlined_call_operand.vmem [shape: f32[1024,32], index: 0, kind: input, shape index: {}]   ;;  %s4715_s1 = inlined_call_operand.vmem [shape: f32[32,32], index: 1, kind: input, shape index: {}]   ;;  %s4716_s2 = inlined_call_operand.vmem [shape: f32[1,32], index: 2, kind: input, shape index: {}]   ;;  %s4717_s3 = inlined_call_operand.vmem [shape: f32[1,32], index: 3, kind: input, shape index: {}]   ;;  %s4718_s4 = inlined_call_operand.vmem [shape: f32[1,32], index: 4, kind: input, shape index: {}]   ;;  %s4719_s5 = inlined_call_operand.vmem [shape: f32[32,16], index: 5, kind: input, shape index: {}]   ;;  %s4720_s6 = inlined_call_operand.vmem [shape: f32[1,16], index: 6, kind: input, shape index: {}]   ;;  %s4721_s7 = inlined_call_operand.vmem [shape: f32[1,16], index: 7, kind: input, shape index: {}]   ;;  %s4722_s8 = inlined_call_operand.vmem [shape: f32[1,16], index: 8, kind: input, shape index: {}]   ;;  %s4723_s9 = inlined_call_operand.vmem [shape: f32[1,16], index: 9, kind: input, shape index: {}]   ;;  %s4724_s10 = inlined_call_operand.vmem [shape: f32[1,16], index: 10, kind: input, shape index: {}]   ;;  %s4725_s11 = inlined_call_operand.<no memory space> [shape: f32[1,1], index: 11, kind: input, shape index: {}]   ;;  %s4726_s12 = inlined_call_operand.hbm [shape: f32[1,1024], index: 12, kind: output, shape index: {}]  }
   0x1   :  { %4733 = sst [smem:[#allocation24_spill]] %s4714_s0  ;;  %v17_v0 = vstv %s4725_s11 }
   0x2   :  { %18 = vst [vmem:[#allocation2] sm:$0x1] %v17_v0 }
   0x3   :  { %19 = vsyncpa [#allocation4], 0 }
   0x4   :  { %21 = vsyncpa [#allocation4 + $0x1], 0  ;;  %s3150_s23 = smov 0   ;;  %s3152_s24 = smov 0  }
   0x5   :  { %s3154_s25 = smov 0   ;;  %s3156_s26 = smov 0  }
   0x6 LB: > { %s3171_s11 = sadd.s32 4294967295, %s3078_s26   ;;  %s2614_s27 = sadd.s32 4294967294, %s3078_s26   ;;  %s3078_s26 = sphi %s3156_s26, %s4776_s26   ;;  %s3074_s25 = sphi %s3154_s25, %s4775_s25   ;;  %s3070_s24 = sphi %s3152_s24, %s4774_s24   ;;  %s3066_s23 = sphi %s3150_s23, %s4773_s23  }
   0x7   : > { %s3175_s28 = sadd.s32 1, %s3078_s26   ;;  %s291_s29 = sadd.s32 1, %s3074_s25 }
   0x8   : > { %s288_s30 = ssub.s32 %s3078_s26, %s3175_s28  ;;  %p301_p0 = scmp.ne.s32.totalorder %s3074_s25, %s3070_s24 }
   0x9   : > { %p289_p1 = scmp.eq.s32.totalorder %s288_s30, 0  ;;  %p302_p2 = scmp.eq.s32.totalorder %s3171_s11, 1 }
   0xa   : > { %p307_p3 = scmp.ne.s32.totalorder %s3070_s24, %s3066_s23  ;;  %p308_p4 = scmp.eq.s32.totalorder %s2614_s27, 1 }
   0xb   : > { %s3186_s13 = scalar_select %p289_p1, %s3074_s25, %s291_s29  }
   0xc   : > { %p3188_p5 = por %p302_p2, %p301_p0  ;;  %p3192_p6 = por %p308_p4, %p307_p3 }
   0xd   : > { %p2617_p7 = scmp.ge.s32.totalorder %s3078_s26, 1  ;;  %p368_p8 = scmp.lt.s32.totalorder %s3078_s26, 3 }
   0xf   : > { %p369_p9 = pnand %p2617_p7, %p368_p8 }
  0x11   : > { %372 = sbr.rel (%p369_p9) target bundleno = 1142 (0x476), region = 68 }
  0x16   : > { %v804_v1 = vld [vmem:[%s4715_s1 + $0x18] sm:$0xff]  ;;  %v803_v2 = vld [vmem:[%s4715_s1 + $0x10] sm:$0xff]  ;;  %s2619_s20 = sshll.u32 %s3171_s11, 6  ;;  %v802_v3 = vld [vmem:[%s4715_s1 + $0x8] sm:$0xff]  ;;  %vm809_vm0 = vcmask 261120   ;;  %s4736_s0 = sld [smem:[#allocation24_spill]] }
  0x17   : > { %950 = vmatpush.msra.mxu0 %v804_v1  ;;  %p411_p10 = scmp.lt.s32.totalorder %s2619_s20, 127  ;;  %2889 = vmatpush.msra.mxu2 %v804_v1  ;;  %v801_v4 = vld [vmem:[%s4715_s1] sm:$0xff]  ;;  %v1350_v18 = vld [vmem:[%s4719_s5 + $0x18] sm:$0xff]  ;;  %v1349_v19 = vld [vmem:[%s4719_s5 + $0x10] sm:$0xff]  ;;  %s3080_s21 = smov 112   ;;  %vm1958_vm1 = vcmask 130048  }
  0x18   : > { %1559 = vmatpush.msra.mxu1 %v1350_v18  ;;  %2893 = vmatpush.msra.mxu3 %v1350_v18  ;;  %v1348_v20 = vld [vmem:[%s4719_s5 + $0x8] sm:$0xff]  ;;  %v1347_v21 = vld [vmem:[%s4719_s5] sm:$0xff]  ;;  %vm2527_vm2 = vcmask 1040384   ;;  %vm2529_vm3 = vcmask 1042434   ;;  %vm2531_vm4 = vcmask 1041408   ;;  %s3036_s27 = scalar_lea.hbm %s4726_s12, 8 }
  0x19   : > { %951 = vmatpush.msra.mxu0 %v803_v2  ;;  %s4778_s20 = smov (!%p411_p10, %s2619_s20), 127  ;;  %2890 = vmatpush.msra.mxu2 %v803_v2  ;;  %v3278_v25 = vld [vmem:[%s4716_s2] ss:$0 sm:$0xff] }
  0x1a   : > { %s2620_s30 = sshll.u32 %s4778_s20, 3  ;;  %1560 = vmatpush.msra.mxu1 %v1349_v19  ;;  %2894 = vmatpush.msra.mxu3 %v1349_v19  ;;  %v3283_v26 = vld [vmem:[%s4717_s3] ss:$0 sm:$0xff]  ;;  %s407_s20 = sand.u32 1, %s3070_s24  }
  0x1b   : > { %952 = vmatpush.msra.mxu0 %v802_v3  ;;  %2891 = vmatpush.msra.mxu2 %v802_v3  ;;  %v3290_v30 = vld [vmem:[%s4718_s4] ss:$0 sm:$0xff] }
  0x1c   : > { %s3214_s18 = scalar_lea.vmem %s4736_s0, %s2620_s30  ;;  %1561 = vmatpush.msra.mxu1 %v1348_v20  ;;  %2895 = vmatpush.msra.mxu3 %v1348_v20 }
  0x1d   : > { %953 = vmatpush.msra.mxu0 %v801_v4  ;;  %v417_v5 = vld [vmem:[%s3214_s18] sm:$0xff]  ;;  %2892 = vmatpush.msra.mxu2 %v801_v4  ;;  %v418_v6 = vld [vmem:[%s3214_s18 + $0x8] sm:$0xff]  ;;  %v419_v7 = vld [vmem:[%s3214_s18 + $0x10] sm:$0xff] }
  0x1e   : > { %2621 = vmatmul.msk.f32.vlgmr.msra.gmra.mxu0 %vm809_vm0, %v417_v5  ;;  %v420_v8 = vld [vmem:[%s3214_s18 + $0x18] sm:$0xff]  ;;  %v421_v9 = vld [vmem:[%s3214_s18 + $0x20] sm:$0xff]  ;;  %v422_v10 = vld [vmem:[%s3214_s18 + $0x28] sm:$0xff]  ;;  %1562 = vmatpush.msra.mxu1 %v1347_v21 }
  0x1f   : > { %v423_v11 = vld [vmem:[%s3214_s18 + $0x30] sm:$0xff]  ;;  %v424_v12 = vld [vmem:[%s3214_s18 + $0x38] sm:$0xff]  ;;  %v425_v13 = vld [vmem:[%s3214_s18 + $0x40] sm:$0xff]  ;;  %2896 = vmatpush.msra.mxu3 %v1347_v21 }
  0x20   : > { %v426_v14 = vld [vmem:[%s3214_s18 + $0x48] sm:$0xff]  ;;  %v427_v15 = vld [vmem:[%s3214_s18 + $0x50] sm:$0xff]  ;;  %v3239_v16 = vld [vmem:[%s3214_s18 + $0x58] sm:$0xff] }
  0x21   : > { %v3244_v17 = vld [vmem:[%s3214_s18 + $0x60] sm:$0xff]  ;;  %v3261_v22 = vld [vmem:[%s3214_s18 + $0x68] sm:$0xff]  ;;  %v3266_v23 = vld [vmem:[%s3214_s18 + $0x70] sm:$0xff] }
  0x22   : > { %v3271_v24 = vld [vmem:[%s3214_s18 + $0x78] sm:$0xff]  ;;  %v433_v28 = vld [vmem:[%s3214_s18 + $0x80] sm:$0xff]  ;;  %v434_v35 = vld [vmem:[%s3214_s18 + $0x88] sm:$0xff]  ;;  %573 = vrot.lane.b32.xlu1 %v3266_v23, %s3080_s21 }
  0x23   : > { %v435_v41 = vld [vmem:[%s3214_s18 + $0x90] sm:$0xff]  ;;  %v436_v47 = vld [vmem:[%s3214_s18 + $0x98] sm:$0xff]  ;;  %v437_v53 = vld [vmem:[%s3214_s18 + $0xa0] sm:$0xff]  ;;  %575 = vrot.lane.b32.xlu0 %v3271_v24, %s3080_s21 }
  0x24   : > { %v438_v59 = vld [vmem:[%s3214_s18 + $0xa8] sm:$0xff]  ;;  %v3326_v1 = vld [vmem:[%s3214_s18 + $0xb0] sm:$0xff]  ;;  %571 = vrot.lane.b32.xlu2 %v3261_v22, %s3080_s21 }
  0x25   : > { %v3353_v21 = vld [vmem:[%s3214_s18 + $0xc8] sm:$0xff] }
  0x26   : > { %2622 = vmatmul.msk.f32.gmra.mxu0 %vm809_vm0, %v418_v6 }
  0x2e   : > { %2623 = vmatmul.msk.f32.gmra.mxu0 %vm809_vm0, %v419_v7  ;;  %v3335_v7 = vld [vmem:[%s3214_s18 + $0xb8] sm:$0xff] }
  0x36   : > { %2624 = vmatmul.msk.f32.gmra.mxu0 %vm809_vm0, %v420_v8 }
  0x3e   : > { %2625 = vmatmul.msk.f32.gmra.mxu0 %vm809_vm0, %v421_v9 }
  0x46   : > { %2626 = vmatmul.msk.f32.gmra.mxu0 %vm809_vm0, %v422_v10 }
  0x4e   : > { %2627 = vmatmul.msk.f32.gmra.mxu0 %vm809_vm0, %v423_v11 }
  0x56   : > { %2628 = vmatmul.msk.f32.gmra.mxu0 %vm809_vm0, %v424_v12 }
  0x5e   : > { %2629 = vmatmul.msk.f32.gmra.mxu0 %vm809_vm0, %v425_v13  ;;  %v3344_v13 = vld [vmem:[%s3214_s18 + $0xc0] sm:$0xff] }
  0x66   : > { %2630 = vmatmul.msk.f32.gmra.mxu0 %vm809_vm0, %v426_v14 }
  0x6e   : > { %2631 = vmatmul.msk.f32.gmra.mxu0 %vm809_vm0, %v427_v15 }
  0x76   : > { %2632 = vmatmul.msk.f32.gmra.mxu0 %vm809_vm0, %v3239_v16 }
  0x7e   : > { %2633 = vmatmul.msk.f32.gmra.mxu0 %vm809_vm0, %v3244_v17 }
  0x86   : > { %2634 = vmatmul.msk.f32.gmra.mxu0 %vm809_vm0, %v3261_v22 }
  0x8e   : > { %2635 = vmatmul.msk.f32.gmra.mxu0 %vm809_vm0, %v3266_v23 }
  0x96   : > { %2636 = vmatmul.msk.f32.gmra.mxu0 %vm809_vm0, %v3271_v24 }
  0x9b   : > { %v955_v27 = vpop.f32.mrf.mxu0 }
  0x9c   : > { %v956_v29 = vadd.f32 %v3278_v25, %v955_v27 }
  0x9e   : > { %v1151_v31 = vmul.f32 %v3283_v26, %v956_v29  ;;  %2637 = vmatmul.msk.f32.gmra.mxu0 %vm809_vm0, %v433_v28 }
  0xa0   : > { %v1219_v32 = vadd.f32 %v3290_v30, %v1151_v31 }
  0xa2   : > { %v1283_v33 = vmax.f32 %v1219_v32, 0.0 }
  0xa3   : > { %v958_v34 = vpop.f32.mrf.mxu0 }
  0xa4   : > { %v959_v36 = vadd.f32 %v3278_v25, %v958_v34  ;;  %2685 = vmatmul.msk.f32.vlgmr.msra.gmra.mxu1 %vm809_vm0, %v1283_v33  ;;  %v3362_v33 = vld [vmem:[%s3214_s18 + $0xd0] sm:$0xff] }
  0xa6   : > { %v1152_v37 = vmul.f32 %v3283_v26, %v959_v36  ;;  %2638 = vmatmul.msk.f32.gmra.mxu0 %vm809_vm0, %v434_v35 }
  0xa8   : > { %v1220_v38 = vadd.f32 %v3290_v30, %v1152_v37 }
  0xaa   : > { %v1284_v39 = vmax.f32 %v1220_v38, 0.0 }
  0xab   : > { %v961_v40 = vpop.f32.mrf.mxu0 }
  0xac   : > { %v962_v42 = vadd.f32 %v3278_v25, %v961_v40  ;;  %2686 = vmatmul.msk.f32.gmra.mxu1 %vm809_vm0, %v1284_v39  ;;  %v3371_v39 = vld [vmem:[%s3214_s18 + $0xd8] sm:$0xff] }
  0xae   : > { %v1153_v43 = vmul.f32 %v3283_v26, %v962_v42  ;;  %2639 = vmatmul.msk.f32.gmra.mxu0 %vm809_vm0, %v435_v41 }
  0xb0   : > { %v1221_v44 = vadd.f32 %v3290_v30, %v1153_v43 }
  0xb2   : > { %v1285_v45 = vmax.f32 %v1221_v44, 0.0 }
  0xb3   : > { %v964_v46 = vpop.f32.mrf.mxu0 }
  0xb4   : > { %v965_v48 = vadd.f32 %v3278_v25, %v964_v46  ;;  %2687 = vmatmul.msk.f32.gmra.mxu1 %vm809_vm0, %v1285_v45  ;;  %v3380_v45 = vld [vmem:[%s3214_s18 + $0xe0] sm:$0xff] }
  0xb6   : > { %v1154_v49 = vmul.f32 %v3283_v26, %v965_v48  ;;  %2640 = vmatmul.msk.f32.gmra.mxu0 %vm809_vm0, %v436_v47 }
  0xb8   : > { %v1222_v50 = vadd.f32 %v3290_v30, %v1154_v49 }
  0xba   : > { %v1286_v51 = vmax.f32 %v1222_v50, 0.0 }
  0xbb   : > { %v967_v52 = vpop.f32.mrf.mxu0 }
  0xbc   : > { %v968_v54 = vadd.f32 %v3278_v25, %v967_v52  ;;  %2688 = vmatmul.msk.f32.gmra.mxu1 %vm809_vm0, %v1286_v51  ;;  %v3389_v51 = vld [vmem:[%s3214_s18 + $0xe8] sm:$0xff] }
  0xbd   : > { %603 = vrot.lane.b32.xlu2 %v3389_v51, %s3080_s21 }
  0xbe   : > { %v1155_v55 = vmul.f32 %v3283_v26, %v968_v54  ;;  %2641 = vmatmul.msk.f32.gmra.mxu0 %vm809_vm0, %v437_v53 }
  0xc0   : > { %v1223_v56 = vadd.f32 %v3290_v30, %v1155_v55 }
  0xc2   : > { %v1287_v57 = vmax.f32 %v1223_v56, 0.0 }
  0xc3   : > { %v970_v58 = vpop.f32.mrf.mxu0 }
  0xc4   : > { %v971_v60 = vadd.f32 %v3278_v25, %v970_v58  ;;  %2689 = vmatmul.msk.f32.gmra.mxu1 %vm809_vm0, %v1287_v57  ;;  %v3398_v57 = vld [vmem:[%s3214_s18 + $0xf0] sm:$0xff] }
  0xc5   : > { %605 = vrot.lane.b32.xlu1 %v3398_v57, %s3080_s21  ;;  %569 = vrot.lane.b32.xlu2 %v3244_v17, %s3080_s21 }
  0xc6   : > { %v1156_v61 = vmul.f32 %v3283_v26, %v971_v60  ;;  %2642 = vmatmul.msk.f32.gmra.mxu0 %vm809_vm0, %v438_v59 }
  0xc8   : > { %v1224_v62 = vadd.f32 %v3290_v30, %v1156_v61 }
  0xca   : > { %v1288_v63 = vmax.f32 %v1224_v62, 0.0 }
  0xcb   : > { %v973_v0 = vpop.f32.mrf.mxu0 }
  0xcc   : > { %v974_v2 = vadd.f32 %v3278_v25, %v973_v0  ;;  %2690 = vmatmul.msk.f32.gmra.mxu1 %vm809_vm0, %v1288_v63  ;;  %v3407_v63 = vld [vmem:[%s3214_s18 + $0xf8] sm:$0xff] }
  0xcd   : > { %607 = vrot.lane.b32.xlu0 %v3407_v63, %s3080_s21 }
  0xce   : > { %v1157_v3 = vmul.f32 %v3283_v26, %v974_v2  ;;  %2643 = vmatmul.msk.f32.gmra.mxu0 %vm809_vm0, %v3326_v1 }
  0xd0   : > { %v1225_v4 = vadd.f32 %v3290_v30, %v1157_v3 }
  0xd2   : > { %v1289_v5 = vmax.f32 %v1225_v4, 0.0 }
  0xd3   : > { %v976_v6 = vpop.f32.mrf.mxu0 }
  0xd4   : > { %v977_v8 = vadd.f32 %v3278_v25, %v976_v6  ;;  %2691 = vmatmul.msk.f32.gmra.mxu1 %vm809_vm0, %v1289_v5  ;;  %v449_v6 = vld [vmem:[%s3214_s18 + $0x100] sm:$0xff] }
  0xd6   : > { %v1158_v9 = vmul.f32 %v3283_v26, %v977_v8  ;;  %2644 = vmatmul.msk.f32.gmra.mxu0 %vm809_vm0, %v3335_v7 }
  0xd8   : > { %v1226_v10 = vadd.f32 %v3290_v30, %v1158_v9 }
  0xda   : > { %v1290_v11 = vmax.f32 %v1226_v10, 0.0 }
  0xdb   : > { %v979_v12 = vpop.f32.mrf.mxu0 }
  0xdc   : > { %v980_v14 = vadd.f32 %v3278_v25, %v979_v12  ;;  %2692 = vmatmul.msk.f32.gmra.mxu1 %vm809_vm0, %v1290_v11 }
  0xde   : > { %v1159_v15 = vmul.f32 %v3283_v26, %v980_v14  ;;  %2645 = vmatmul.msk.f32.gmra.mxu0 %vm809_vm0, %v3344_v13 }
  0xe0   : > { %v1227_v18 = vadd.f32 %v3290_v30, %v1159_v15  ;;  %v450_v15 = vld [vmem:[%s3214_s18 + $0x108] sm:$0xff] }
  0xe2   : > { %v1291_v19 = vmax.f32 %v1227_v18, 0.0 }
  0xe3   : > { %v982_v20 = vpop.f32.mrf.mxu0 }
  0xe4   : > { %v983_v27 = vadd.f32 %v3278_v25, %v982_v20  ;;  %2693 = vmatmul.msk.f32.gmra.mxu1 %vm809_vm0, %v1291_v19 }
  0xe6   : > { %v1160_v28 = vmul.f32 %v3283_v26, %v983_v27  ;;  %2646 = vmatmul.msk.f32.gmra.mxu0 %vm809_vm0, %v3353_v21 }
  0xe8   : > { %v1228_v29 = vadd.f32 %v3290_v30, %v1160_v28 }
  0xea   : > { %v1292_v31 = vmax.f32 %v1228_v29, 0.0 }
  0xeb   : > { %v985_v32 = vpop.f32.mrf.mxu0 }
  0xec   : > { %v986_v34 = vadd.f32 %v3278_v25, %v985_v32  ;;  %2694 = vmatmul.msk.f32.gmra.mxu1 %vm809_vm0, %v1292_v31  ;;  %v451_v31 = vld [vmem:[%s3214_s18 + $0x110] sm:$0xff] }
  0xee   : > { %v1161_v35 = vmul.f32 %v3283_v26, %v986_v34  ;;  %2647 = vmatmul.msk.f32.gmra.mxu0 %vm809_vm0, %v3362_v33 }
  0xf0   : > { %v1229_v36 = vadd.f32 %v3290_v30, %v1161_v35 }
  0xf2   : > { %v1293_v37 = vmax.f32 %v1229_v36, 0.0 }
  0xf3   : > { %v988_v38 = vpop.f32.mrf.mxu0 }
  0xf4   : > { %v989_v40 = vadd.f32 %v3278_v25, %v988_v38  ;;  %2695 = vmatmul.msk.f32.gmra.mxu1 %vm809_vm0, %v1293_v37 }
  0xf6   : > { %v1162_v41 = vmul.f32 %v3283_v26, %v989_v40  ;;  %2648 = vmatmul.msk.f32.gmra.mxu0 %vm809_vm0, %v3371_v39  ;;  %v3440_v40 = vld [vmem:[%s3214_s18 + $0x118] sm:$0xff] }
  0xf8   : > { %v1230_v42 = vadd.f32 %v3290_v30, %v1162_v41 }
  0xfa   : > { %v1294_v43 = vmax.f32 %v1230_v42, 0.0 }
  0xfb   : > { %v991_v44 = vpop.f32.mrf.mxu0 }
  0xfc   : > { %v992_v46 = vadd.f32 %v3278_v25, %v991_v44  ;;  %2696 = vmatmul.msk.f32.gmra.mxu1 %vm809_vm0, %v1294_v43 }
  0xfe   : > { %v1163_v47 = vmul.f32 %v3283_v26, %v992_v46  ;;  %2649 = vmatmul.msk.f32.gmra.mxu0 %vm809_vm0, %v3380_v45 }
 0x100   : > { %v1231_v48 = vadd.f32 %v3290_v30, %v1163_v47 }
 0x102   : > { %v1295_v49 = vmax.f32 %v1231_v48, 0.0  ;;  %v3451_v48 = vld [vmem:[%s3214_s18 + $0x120] sm:$0xff] }
 0x103   : > { %v994_v50 = vpop.f32.mrf.mxu0 }
 0x104   : > { %v995_v52 = vadd.f32 %v3278_v25, %v994_v50  ;;  %2697 = vmatmul.msk.f32.gmra.mxu1 %vm809_vm0, %v1295_v49 }
 0x106   : > { %v1164_v53 = vmul.f32 %v3283_v26, %v995_v52  ;;  %2650 = vmatmul.msk.f32.gmra.mxu0 %vm809_vm0, %v3389_v51 }
 0x108   : > { %v1232_v54 = vadd.f32 %v3290_v30, %v1164_v53 }
 0x10a   : > { %v1296_v55 = vmax.f32 %v1232_v54, 0.0 }
 0x10b   : > { %v997_v56 = vpop.f32.mrf.mxu0 }
 0x10c   : > { %v998_v58 = vadd.f32 %v3278_v25, %v997_v56  ;;  %2698 = vmatmul.msk.f32.gmra.mxu1 %vm809_vm0, %v1296_v55  ;;  %v3462_v56 = vld [vmem:[%s3214_s18 + $0x128] sm:$0xff] }
 0x10e   : > { %v1165_v59 = vmul.f32 %v3283_v26, %v998_v58  ;;  %2651 = vmatmul.msk.f32.gmra.mxu0 %vm809_vm0, %v3398_v57 }
 0x110   : > { %v1233_v60 = vadd.f32 %v3290_v30, %v1165_v59 }
 0x112   : > { %v1297_v61 = vmax.f32 %v1233_v60, 0.0 }
 0x113   : > { %v1000_v62 = vpop.f32.mrf.mxu0 }
 0x114   : > { %v1001_v0 = vadd.f32 %v3278_v25, %v1000_v62  ;;  %2699 = vmatmul.msk.f32.gmra.mxu1 %vm809_vm0, %v1297_v61 }
 0x116   : > { %v1166_v2 = vmul.f32 %v3283_v26, %v1001_v0  ;;  %2652 = vmatmul.msk.f32.gmra.mxu0 %vm809_vm0, %v3407_v63 }
 0x118   : > { %v1234_v3 = vadd.f32 %v3290_v30, %v1166_v2  ;;  %v3473_v2 = vld [vmem:[%s3214_s18 + $0x130] sm:$0xff] }
 0x11a   : > { %v1298_v4 = vmax.f32 %v1234_v3, 0.0 }
 0x11b   : > { %v1003_v5 = vpop.f32.mrf.mxu0 }
 0x11c   : > { %v1004_v8 = vadd.f32 %v3278_v25, %v1003_v5  ;;  %2700 = vmatmul.msk.f32.gmra.mxu1 %vm809_vm0, %v1298_v4 }
 0x11e   : > { %v1167_v9 = vmul.f32 %v3283_v26, %v1004_v8  ;;  %2653 = vmatmul.msk.f32.gmra.mxu0 %vm809_vm0, %v449_v6 }
 0x120   : > { %v1235_v10 = vadd.f32 %v3290_v30, %v1167_v9 }
 0x121   : > { %v3421_v11 = vpop.f32.mrf.mxu1 }
 0x122   : > { %v1299_v12 = vmax.f32 %v1235_v10, 0.0  ;;  %v3484_v10 = vld [vmem:[%s3214_s18 + $0x138] sm:$0xff] }
 0x123   : > { %v1006_v14 = vpop.f32.mrf.mxu0 }
 0x124   : > { %v1007_v18 = vadd.f32 %v3278_v25, %v1006_v14  ;;  %2701 = vmatmul.msk.f32.gmra.mxu1 %vm809_vm0, %v1299_v12 }
 0x126   : > { %v1168_v19 = vmul.f32 %v3283_v26, %v1007_v18  ;;  %2654 = vmatmul.msk.f32.gmra.mxu0 %vm809_vm0, %v450_v15 }
 0x128   : > { %v1236_v20 = vadd.f32 %v3290_v30, %v1168_v19 }
 0x129   : > { %v3429_v27 = vpop.f32.mrf.mxu1 }
 0x12a   : > { %v1300_v28 = vmax.f32 %v1236_v20, 0.0 }
 0x12b   : > { %v1009_v29 = vpop.f32.mrf.mxu0 }
 0x12c   : > { %v1010_v32 = vadd.f32 %v3278_v25, %v1009_v29  ;;  %2702 = vmatmul.msk.f32.gmra.mxu1 %vm809_vm0, %v1300_v28  ;;  %v3495_v28 = vld [vmem:[%s3214_s18 + $0x140] sm:$0xff] }
 0x12e   : > { %v1169_v34 = vmul.f32 %v3283_v26, %v1010_v32  ;;  %2655 = vmatmul.msk.f32.gmra.mxu0 %vm809_vm0, %v451_v31 }
 0x130   : > { %v1237_v35 = vadd.f32 %v3290_v30, %v1169_v34 }
 0x131   : > { %v3437_v36 = vpop.f32.mrf.mxu1 }
 0x132   : > { %v1301_v37 = vmax.f32 %v1237_v35, 0.0 }
 0x133   : > { %v1012_v38 = vpop.f32.mrf.mxu0 }
 0x134   : > { %v1013_v41 = vadd.f32 %v3278_v25, %v1012_v38  ;;  %2703 = vmatmul.msk.f32.gmra.mxu1 %vm809_vm0, %v1301_v37  ;;  %v3506_v38 = vld [vmem:[%s3214_s18 + $0x148] sm:$0xff] }
 0x136   : > { %v1170_v42 = vmul.f32 %v3283_v26, %v1013_v41  ;;  %2656 = vmatmul.msk.f32.gmra.mxu0 %vm809_vm0, %v3440_v40 }
 0x138   : > { %v1238_v43 = vadd.f32 %v3290_v30, %v1170_v42 }
 0x139   : > { %v3448_v44 = vpop.f32.mrf.mxu1 }
 0x13a   : > { %v1302_v46 = vmax.f32 %v1238_v43, 0.0 }
 0x13b   : > { %v1015_v47 = vpop.f32.mrf.mxu0 }
 0x13c   : > { %v1016_v49 = vadd.f32 %v3278_v25, %v1015_v47  ;;  %2704 = vmatmul.msk.f32.gmra.mxu1 %vm809_vm0, %v1302_v46 }
 0x13e   : > { %v1171_v50 = vmul.f32 %v3283_v26, %v1016_v49  ;;  %2657 = vmatmul.msk.f32.gmra.mxu0 %vm809_vm0, %v3451_v48 }
 0x140   : > { %v1239_v52 = vadd.f32 %v3290_v30, %v1171_v50  ;;  %v3517_v50 = vld [vmem:[%s3214_s18 + $0x150] sm:$0xff] }
 0x141   : > { %v3459_v53 = vpop.f32.mrf.mxu1 }
 0x142   : > { %v1303_v54 = vmax.f32 %v1239_v52, 0.0 }
 0x143   : > { %v1018_v55 = vpop.f32.mrf.mxu0 }
 0x144   : > { %v1019_v58 = vadd.f32 %v3278_v25, %v1018_v55  ;;  %2705 = vmatmul.msk.f32.gmra.mxu1 %vm809_vm0, %v1303_v54  ;;  %v3525_v55 = vld [vmem:[%s3214_s18 + $0x178] sm:$0xff] }
 0x145   : > { %2668 = vmatmul.msk.f32.vlgmr.msra.gmra.mxu2 %vm809_vm0, %v3525_v55  ;;  %639 = vrot.lane.b32.xlu0 %v3525_v55, %s3080_s21 }
 0x146   : > { %v1172_v59 = vmul.f32 %v3283_v26, %v1019_v58  ;;  %2658 = vmatmul.msk.f32.gmra.mxu0 %vm809_vm0, %v3462_v56 }
 0x148   : > { %v1240_v60 = vadd.f32 %v3290_v30, %v1172_v59 }
 0x149   : > { %v3470_v61 = vpop.f32.mrf.mxu1 }
 0x14a   : > { %v1304_v62 = vmax.f32 %v1240_v60, 0.0 }
 0x14b   : > { %v1021_v0 = vpop.f32.mrf.mxu0 }
 0x14c   : > { %v1022_v3 = vadd.f32 %v3278_v25, %v1021_v0  ;;  %2706 = vmatmul.msk.f32.gmra.mxu1 %vm809_vm0, %v1304_v62  ;;  %v3533_v0 = vld [vmem:[%s3214_s18 + $0x158] sm:$0xff] }
 0x14d   : > { %601 = vrot.lane.b32.xlu0 %v3380_v45, %s3080_s21 }
 0x14e   : > { %v1173_v4 = vmul.f32 %v3283_v26, %v1022_v3  ;;  %2659 = vmatmul.msk.f32.gmra.mxu0 %vm809_vm0, %v3473_v2 }
 0x150   : > { %v1241_v5 = vadd.f32 %v3290_v30, %v1173_v4 }
 0x151   : > { %v3481_v6 = vpop.f32.mrf.mxu1 }
 0x152   : > { %v1305_v8 = vmax.f32 %v1241_v5, 0.0  ;;  %v3541_v5 = vld [vmem:[%s3214_s18 + $0x180] sm:$0xff] }
 0x153   : > { %v1024_v9 = vpop.f32.mrf.mxu0  ;;  %2669 = vmatmul.msk.f32.gmra.mxu2 %vm809_vm0, %v3541_v5 }
 0x154   : > { %v1025_v12 = vadd.f32 %v3278_v25, %v1024_v9  ;;  %2707 = vmatmul.msk.f32.gmra.mxu1 %vm809_vm0, %v1305_v8 }
 0x155   : > { %567 = vrot.lane.b32.xlu0 %v3239_v16, %s3080_s21 }
 0x156   : > { %v1174_v14 = vmul.f32 %v3283_v26, %v1025_v12  ;;  %2660 = vmatmul.msk.f32.gmra.mxu0 %vm809_vm0, %v3484_v10 }
 0x158   : > { %v1242_v15 = vadd.f32 %v3290_v30, %v1174_v14 }
 0x159   : > { %v3492_v18 = vpop.f32.mrf.mxu1 }
 0x15a   : > { %v1306_v19 = vmax.f32 %v1242_v15, 0.0  ;;  %v3549_v15 = vld [vmem:[%s3214_s18 + $0x160] sm:$0xff] }
 0x15b   : > { %v1027_v20 = vpop.f32.mrf.mxu0 }
 0x15c   : > { %v1028_v29 = vadd.f32 %v3278_v25, %v1027_v20  ;;  %2708 = vmatmul.msk.f32.gmra.mxu1 %vm809_vm0, %v1306_v19 }
 0x15e   : > { %v1175_v31 = vmul.f32 %v3283_v26, %v1028_v29  ;;  %2661 = vmatmul.msk.f32.gmra.mxu0 %vm809_vm0, %v3495_v28  ;;  %v3557_v29 = vld [vmem:[%s3214_s18 + $0x188] sm:$0xff] }
 0x15f   : > { %2670 = vmatmul.msk.f32.gmra.mxu2 %vm809_vm0, %v3557_v29 }
 0x160   : > { %v1243_v32 = vadd.f32 %v3290_v30, %v1175_v31 }
 0x161   : > { %v3503_v34 = vpop.f32.mrf.mxu1 }
 0x162   : > { %v1307_v35 = vmax.f32 %v1243_v32, 0.0 }
 0x163   : > { %v1030_v37 = vpop.f32.mrf.mxu0 }
 0x164   : > { %v1031_v41 = vadd.f32 %v3278_v25, %v1030_v37  ;;  %2709 = vmatmul.msk.f32.gmra.mxu1 %vm809_vm0, %v1307_v35 }
 0x166   : > { %v1176_v42 = vmul.f32 %v3283_v26, %v1031_v41  ;;  %2662 = vmatmul.msk.f32.gmra.mxu0 %vm809_vm0, %v3506_v38  ;;  %v3563_v41 = vld [vmem:[%s3214_s18 + $0x168] sm:$0xff] }
 0x168   : > { %v1244_v43 = vadd.f32 %v3290_v30, %v1176_v42 }
 0x169   : > { %v3514_v46 = vpop.f32.mrf.mxu1 }
 0x16a   : > { %v1308_v47 = vmax.f32 %v1244_v43, 0.0 }
 0x16b   : > { %v1033_v49 = vpop.f32.mrf.mxu0 }
 0x16c   : > { %v1034_v52 = vadd.f32 %v3278_v25, %v1033_v49  ;;  %2710 = vmatmul.msk.f32.gmra.mxu1 %vm809_vm0, %v1308_v47  ;;  %v3571_v47 = vld [vmem:[%s3214_s18 + $0x190] sm:$0xff] }
 0x16d   : > { %2671 = vmatmul.msk.f32.gmra.mxu2 %vm809_vm0, %v3571_v47 }
 0x16e   : > { %v1177_v54 = vmul.f32 %v3283_v26, %v1034_v52  ;;  %2663 = vmatmul.msk.f32.gmra.mxu0 %vm809_vm0, %v3517_v50 }
 0x170   : > { %v1245_v58 = vadd.f32 %v3290_v30, %v1177_v54 }
 0x171   : > { %v3530_v59 = vpop.f32.mrf.mxu1 }
 0x172   : > { %v1309_v60 = vmax.f32 %v1245_v58, 0.0 }
 0x173   : > { %v1036_v62 = vpop.f32.mrf.mxu0 }
 0x174   : > { %v1037_v3 = vadd.f32 %v3278_v25, %v1036_v62  ;;  %2711 = vmatmul.msk.f32.gmra.mxu1 %vm809_vm0, %v1309_v60  ;;  %v3577_v60 = vld [vmem:[%s3214_s18 + $0x170] sm:$0xff] }
 0x176   : > { %v1178_v4 = vmul.f32 %v3283_v26, %v1037_v3  ;;  %2664 = vmatmul.msk.f32.gmra.mxu0 %vm809_vm0, %v3533_v0 }
 0x178   : > { %v1246_v8 = vadd.f32 %v3290_v30, %v1178_v4  ;;  %v3585_v4 = vld [vmem:[%s3214_s18 + $0x198] sm:$0xff] }
 0x179   : > { %v3546_v9 = vpop.f32.mrf.mxu1  ;;  %2672 = vmatmul.msk.f32.gmra.mxu2 %vm809_vm0, %v3585_v4 }
 0x17a   : > { %v1310_v12 = vmax.f32 %v1246_v8, 0.0 }
 0x17b   : > { %v1039_v14 = vpop.f32.mrf.mxu0 }
 0x17c   : > { %v1040_v19 = vadd.f32 %v3278_v25, %v1039_v14  ;;  %2712 = vmatmul.msk.f32.gmra.mxu1 %vm809_vm0, %v1310_v12 }
 0x17e   : > { %v1179_v20 = vmul.f32 %v3283_v26, %v1040_v19  ;;  %2665 = vmatmul.msk.f32.gmra.mxu0 %vm809_vm0, %v3549_v15 }
 0x180   : > { %v1247_v31 = vadd.f32 %v3290_v30, %v1179_v20 }
 0x181   : > { %v1600_v32 = vpop.f32.mrf.mxu1 }
 0x182   : > { %v1311_v35 = vmax.f32 %v1247_v31, 0.0  ;;  %v3595_v31 = vld [vmem:[%s4720_s6] ss:$0 sm:$0xff] }
 0x183   : > { %v1042_v37 = vpop.f32.mrf.mxu0  ;;  %v1598_v22 = vadd.f32 %v3595_v31, %v3546_v9  ;;  %v1595_v9 = vadd.f32 %v3595_v31, %v3530_v59  ;;  %v1592_v51 = vadd.f32 %v3595_v31, %v3514_v46  ;;  %v1589_v46 = vadd.f32 %v3595_v31, %v3503_v34 }
 0x184   : > { %v1043_v42 = vadd.f32 %v3278_v25, %v1042_v37  ;;  %2713 = vmatmul.msk.f32.gmra.mxu1 %vm809_vm0, %v1311_v35  ;;  %v3599_v37 = vld [vmem:[%s3214_s18 + $0x1a0] sm:$0xff]  ;;  %v1586_v17 = vadd.f32 %v3595_v31, %v3492_v18  ;;  %v1583_v18 = vadd.f32 %v3595_v31, %v3481_v6  ;;  %v1580_v6 = vadd.f32 %v3595_v31, %v3470_v61 }
 0x185   : > { %2673 = vmatmul.msk.f32.gmra.mxu2 %vm809_vm0, %v3599_v37  ;;  %v1577_v61 = vadd.f32 %v3595_v31, %v3459_v53  ;;  %v1574_v53 = vadd.f32 %v3595_v31, %v3448_v44 }
 0x186   : > { %v1180_v43 = vmul.f32 %v3283_v26, %v1043_v42  ;;  %2666 = vmatmul.msk.f32.gmra.mxu0 %vm809_vm0, %v3563_v41 }
 0x188   : > { %v1248_v49 = vadd.f32 %v3290_v30, %v1180_v43 }
 0x189   : > { %v1603_v52 = vpop.f32.mrf.mxu1 }
 0x18a   : > { %v1312_v54 = vmax.f32 %v1248_v49, 0.0 }
 0x18b   : > { %v1045_v58 = vpop.f32.mrf.mxu0 }
 0x18c   : > { %v1046_v62 = vadd.f32 %v3278_v25, %v1045_v58  ;;  %2714 = vmatmul.msk.f32.gmra.mxu1 %vm809_vm0, %v1312_v54  ;;  %v3608_v54 = vld [vmem:[%s4721_s7] ss:$0 sm:$0xff] }
 0x18d   : > { %v1763_v44 = vmul.f32 %v3608_v54, %v1574_v53  ;;  %v3771_v53 = vld [vmem:[%s3214_s18 + $0x1d8] sm:$0xff] }
 0x18e   : > { %v1181_v3 = vmul.f32 %v3283_v26, %v1046_v62  ;;  %2667 = vmatmul.msk.f32.gmra.mxu0 %vm809_vm0, %v3577_v60 }
 0x190   : > { %v1249_v8 = vadd.f32 %v3290_v30, %v1181_v3 }
 0x191   : > { %v1606_v12 = vpop.f32.mrf.mxu1 }
 0x192   : > { %v1313_v14 = vmax.f32 %v1249_v8, 0.0  ;;  %v1607_v42 = vadd.f32 %v3595_v31, %v1606_v12  ;;  %v1604_v8 = vadd.f32 %v3595_v31, %v1603_v52 }
 0x193   : > { %v1048_v19 = vpop.f32.mrf.mxu0 }
 0x194   : > { %v1049_v20 = vadd.f32 %v3278_v25, %v1048_v19  ;;  %2715 = vmatmul.msk.f32.gmra.mxu1 %vm809_vm0, %v1313_v14  ;;  %v1774_v12 = vmul.f32 %v3608_v54, %v1607_v42  ;;  %v1601_v42 = vadd.f32 %v3595_v31, %v1600_v32 }
 0x196   : > { %v1182_v35 = vmul.f32 %v3283_v26, %v1049_v20  ;;  %v3619_v20 = vld [vmem:[%s4722_s8] ss:$0 sm:$0xff] }
 0x198   : > { %v1250_v43 = vadd.f32 %v3290_v30, %v1182_v35 }
 0x199   : > { %v1609_v49 = vpop.f32.mrf.mxu1 }
 0x19a   : > { %v1314_v58 = vmax.f32 %v1250_v43, 0.0  ;;  %v1610_v62 = vadd.f32 %v3595_v31, %v1609_v49  ;;  %v3631_v43 = vld [vmem:[%s3214_s18 + $0x1a8] sm:$0xff]  ;;  %v1773_v49 = vmul.f32 %v3608_v54, %v1604_v8  ;;  %v1772_v8 = vmul.f32 %v3608_v54, %v1601_v42 }
 0x19b   : > { %v1051_v3 = vpop.f32.mrf.mxu0  ;;  %2674 = vmatmul.msk.f32.gmra.mxu2 %vm809_vm0, %v3631_v43  ;;  %v1771_v42 = vmul.f32 %v3608_v54, %v1598_v22 }
 0x19c   : > { %v1775_v14 = vmul.f32 %v3608_v54, %v1610_v62  ;;  %v1052_v19 = vadd.f32 %v3278_v25, %v1051_v3  ;;  %2716 = vmatmul.msk.f32.gmra.mxu1 %vm809_vm0, %v1314_v58  ;;  %v1842_v62 = vadd.f32 %v3619_v20, %v1774_v12 }
 0x19e   : > { %v1183_v52 = vmul.f32 %v3283_v26, %v1052_v19  ;;  %v1843_v35 = vadd.f32 %v3619_v20, %v1775_v14  ;;  %v1906_v12 = vmax.f32 %v1842_v62, 0.0  ;;  %v1841_v19 = vadd.f32 %v3619_v20, %v1773_v49 }
 0x19f   : > { %v1770_v62 = vmul.f32 %v3608_v54, %v1595_v9 }
 0x1a0   : > { %v1251_v58 = vadd.f32 %v3290_v30, %v1183_v52  ;;  %v1907_v23 = vmax.f32 %v1843_v35, 0.0  ;;  %v3658_v35 = vld [vmem:[%s3214_s18 + $0x1b0] sm:$0xff]  ;;  %v1905_v57 = vmax.f32 %v1841_v19, 0.0 }
 0x1a1   : > { %v3638_v24 = vpop.f32.mrf.mxu1  ;;  %v1838_v9 = vadd.f32 %v3619_v20, %v1770_v62  ;;  %v1767_v62 = vmul.f32 %v3608_v54, %v1586_v17  ;;  %v3729_v17 = vld [vmem:[%s3214_s18 + $0x1c8] sm:$0xff] }
 0x1a2   : > { %v1315_v3 = vmax.f32 %v1251_v58, 0.0  ;;  %2749 = vmatpush.xpose.msk.msrb.mxu2 %vm1958_vm1, %v1907_v23  ;;  %v1840_v58 = vadd.f32 %v3619_v20, %v1772_v8 }
 0x1a3   : > { %v1054_v32 = vpop.f32.mrf.mxu0  ;;  %2675 = vmatmul.msk.f32.gmra.mxu2 %vm809_vm0, %v3658_v35 }
 0x1a4   : > { %v1055_v14 = vadd.f32 %v3278_v25, %v1054_v32  ;;  %2717 = vmatmul.msk.f32.gmra.mxu1 %vm809_vm0, %v1315_v3  ;;  %v1904_v22 = vmax.f32 %v1840_v58, 0.0  ;;  %v1839_v32 = vadd.f32 %v3619_v20, %v1771_v42  ;;  %v1902_v58 = vmax.f32 %v1838_v9, 0.0 }
 0x1a5   : > { %v1835_v9 = vadd.f32 %v3619_v20, %v1767_v62 }
 0x1a6   : > { %v1184_v52 = vmul.f32 %v3283_v26, %v1055_v14  ;;  %2750 = vmatpush.xpose.msk.msrb.mxu2 %vm1958_vm1, %v1906_v12  ;;  %v3683_v14 = vld [vmem:[%s3214_s18 + $0x1b8] sm:$0xff]  ;;  %v1769_v12 = vmul.f32 %v3608_v54, %v1592_v51 }
 0x1a8   : > { %v1252_v49 = vadd.f32 %v3290_v30, %v1184_v52  ;;  %v1903_v52 = vmax.f32 %v1839_v32, 0.0 }
 0x1a9   : > { %v3665_v63 = vpop.f32.mrf.mxu1 }
 0x1aa   : > { %v1316_v23 = vmax.f32 %v1252_v49, 0.0  ;;  %2751 = vmatpush.xpose.msk.msrb.mxu2 %vm1958_vm1, %v1905_v57  ;;  %v1768_v49 = vmul.f32 %v3608_v54, %v1589_v46 }
 0x1ab   : > { %v1057_v59 = vpop.f32.mrf.mxu0  ;;  %2676 = vmatmul.msk.f32.gmra.mxu2 %vm809_vm0, %v3683_v14 }
 0x1ac   : > { %v1058_v3 = vadd.f32 %v3278_v25, %v1057_v59  ;;  %2718 = vmatmul.msk.f32.gmra.mxu1 %vm809_vm0, %v1316_v23  ;;  %v1837_v23 = vadd.f32 %v3619_v20, %v1769_v12  ;;  %v3706_v59 = vld [vmem:[%s3214_s18 + $0x1c0] sm:$0xff]  ;;  %v1836_v32 = vadd.f32 %v3619_v20, %v1768_v49  ;;  %v1766_v12 = vmul.f32 %v3608_v54, %v1583_v18 }
 0x1ad   : > { %v1764_v18 = vmul.f32 %v3608_v54, %v1577_v61 }
 0x1ae   : > { %v1185_v8 = vmul.f32 %v3283_v26, %v1058_v3  ;;  %2752 = vmatpush.xpose.msk.msrb.mxu2 %vm1958_vm1, %v1904_v22  ;;  %v1901_v22 = vmax.f32 %v1837_v23, 0.0 }
 0x1b0   : > { %v1253_v19 = vadd.f32 %v3290_v30, %v1185_v8 }
 0x1b1   : > { %v3690_v55 = vpop.f32.mrf.mxu1 }
 0x1b2   : > { %v1317_v42 = vmax.f32 %v1253_v19, 0.0  ;;  %2753 = vmatpush.xpose.msk.msrb.mxu2 %vm1958_vm1, %v1903_v52  ;;  %v1900_v52 = vmax.f32 %v1836_v32, 0.0 }
 0x1b3   : > { %v1060_v34 = vpop.f32.mrf.mxu0  ;;  %2677 = vmatmul.msk.f32.gmra.mxu2 %vm809_vm0, %v3706_v59 }
 0x1b4   : > { %v1061_v57 = vadd.f32 %v3278_v25, %v1060_v34  ;;  %2719 = vmatmul.msk.f32.gmra.mxu1 %vm809_vm0, %v1317_v42  ;;  %v1765_v34 = vmul.f32 %v3608_v54, %v1580_v6  ;;  %v3750_v6 = vld [vmem:[%s3214_s18 + $0x1d0] sm:$0xff] }
 0x1b6   : > { %v1186_v51 = vmul.f32 %v3283_v26, %v1061_v57  ;;  %2754 = vmatpush.xpose.msk.msrb.mxu2 %vm1958_vm1, %v1902_v58  ;;  %v1899_v57 = vmax.f32 %v1835_v9, 0.0  ;;  %v1834_v58 = vadd.f32 %v3619_v20, %v1766_v12 }
 0x1b8   : > { %v1254_v3 = vadd.f32 %v3290_v30, %v1186_v51 }
 0x1b9   : > { %v3713_v45 = vpop.f32.mrf.mxu1 }
 0x1ba   : > { %v1318_v8 = vmax.f32 %v1254_v3, 0.0  ;;  %2755 = vmatpush.xpose.msk.msrb.mxu2 %vm1958_vm1, %v1901_v22  ;;  %v1898_v3 = vmax.f32 %v1834_v58, 0.0  ;;  %v1833_v22 = vadd.f32 %v3619_v20, %v1765_v34 }
 0x1bb   : > { %v1063_v46 = vpop.f32.mrf.mxu0  ;;  %2678 = vmatmul.msk.f32.gmra.mxu2 %vm809_vm0, %v3729_v17 }
 0x1bc   : > { %v1064_v19 = vadd.f32 %v3278_v25, %v1063_v46  ;;  %2720 = vmatmul.msk.f32.gmra.mxu1 %vm809_vm0, %v1318_v8  ;;  %v1571_v8 = vadd.f32 %v3595_v31, %v3437_v36  ;;  %v1897_v12 = vmax.f32 %v1833_v22, 0.0  ;;  %v1568_v36 = vadd.f32 %v3595_v31, %v3429_v27 }
 0x1be   : > { %v1187_v42 = vmul.f32 %v3283_v26, %v1064_v19  ;;  %2756 = vmatpush.xpose.msk.msrb.mxu2 %vm1958_vm1, %v1900_v52  ;;  %v1832_v19 = vadd.f32 %v3619_v20, %v1764_v18  ;;  %v1762_v61 = vmul.f32 %v3608_v54, %v1571_v8  ;;  %v1761_v27 = vmul.f32 %v3608_v54, %v1568_v36 }
 0x1c0   : > { %v1255_v49 = vadd.f32 %v3290_v30, %v1187_v42 }
 0x1c1   : > { %v3736_v16 = vpop.f32.mrf.mxu1 }
 0x1c2   : > { %v1319_v23 = vmax.f32 %v1255_v49, 0.0  ;;  %2757 = vmatpush.xpose.msk.msrb.mxu2 %vm1958_vm1, %v1899_v57  ;;  %v1896_v49 = vmax.f32 %v1832_v19, 0.0  ;;  %v1831_v57 = vadd.f32 %v3619_v20, %v1763_v44  ;;  %v3788_v19 = vld [vmem:[%s3214_s18 + $0x1e0] sm:$0xff] }
 0x1c3   : > { %v1066_v51 = vpop.f32.mrf.mxu0  ;;  %2679 = vmatmul.msk.f32.gmra.mxu2 %vm809_vm0, %v3750_v6 }
 0x1c4   : > { %v1067_v62 = vadd.f32 %v3278_v25, %v1066_v51  ;;  %2721 = vmatmul.msk.f32.gmra.mxu1 %vm809_vm0, %v1319_v23  ;;  %v1565_v23 = vadd.f32 %v3595_v31, %v3421_v11  ;;  %v1895_v18 = vmax.f32 %v1831_v57, 0.0 }
 0x1c6   : > { %v1188_v32 = vmul.f32 %v3283_v26, %v1067_v62  ;;  %2758 = vmatpush.xpose.msk.msrb.mxu2 %vm1958_vm1, %v1898_v3  ;;  %v1830_v62 = vadd.f32 %v3619_v20, %v1762_v61  ;;  %v1760_v11 = vmul.f32 %v3608_v54, %v1565_v23 }
 0x1c8   : > { %v1256_v46 = vadd.f32 %v3290_v30, %v1188_v32  ;;  %v1894_v44 = vmax.f32 %v1830_v62, 0.0 }
 0x1c9   : > { %v3757_v52 = vpop.f32.mrf.mxu1 }
 0x1ca   : > { %v1320_v9 = vmax.f32 %v1256_v46, 0.0  ;;  %2759 = vmatpush.xpose.msk.msrb.mxu2 %vm1958_vm1, %v1897_v12  ;;  %v1829_v46 = vadd.f32 %v3619_v20, %v1761_v27  ;;  %v478_v27 = vld [vmem:[%s3214_s18 + $0x1e8] sm:$0xff] }
 0x1cb   : > { %v1069_v42 = vpop.f32.mrf.mxu0  ;;  %2680 = vmatmul.msk.f32.gmra.mxu2 %vm809_vm0, %v3771_v53  ;;  %667 = vrot.lane.b32.xlu0 %v478_v27, %s3080_s21 }
 0x1cc   : > { %v1070_v34 = vadd.f32 %v3278_v25, %v1069_v42  ;;  %2722 = vmatmul.msk.f32.gmra.mxu1 %vm809_vm0, %v1320_v9  ;;  %v1893_v36 = vmax.f32 %v1829_v46, 0.0  ;;  %v1828_v42 = vadd.f32 %v3619_v20, %v1760_v11 }
 0x1ce   : > { %v1189_v58 = vmul.f32 %v3283_v26, %v1070_v34  ;;  %2760 = vmatpush.xpose.msk.msrb.mxu2 %vm1958_vm1, %v1896_v49 }
 0x1d0   : > { %v1257_v51 = vadd.f32 %v3290_v30, %v1189_v58  ;;  %v1892_v58 = vmax.f32 %v1828_v42, 0.0 }
 0x1d1   : > { %v3778_v3 = vpop.f32.mrf.mxu1 }
 0x1d2   : > { %v1321_v22 = vmax.f32 %v1257_v51, 0.0  ;;  %2761 = vmatpush.xpose.msk.msrb.mxu2 %vm1958_vm1, %v1895_v18 }
 0x1d3   : > { %v1072_v32 = vpop.f32.mrf.mxu0  ;;  %2681 = vmatmul.msk.f32.gmra.mxu2 %vm809_vm0, %v3788_v19  ;;  %633 = vrot.lane.b32.xlu0 %v3549_v15, %s3080_s21 }
 0x1d4   : > { %v1073_v8 = vadd.f32 %v3278_v25, %v1072_v32  ;;  %2723 = vmatmul.msk.f32.gmra.mxu1 %vm809_vm0, %v1321_v22 }
 0x1d6   : > { %v1190_v12 = vmul.f32 %v3283_v26, %v1073_v8  ;;  %2762 = vmatpush.xpose.msk.msrb.mxu2 %vm1958_vm1, %v1894_v44  ;;  %v479_v8 = vld [vmem:[%s3214_s18 + $0x1f0] sm:$0xff] }
 0x1d7   : > { %669 = vrot.lane.b32.xlu2 %v479_v8, %s3080_s21 }
 0x1d8   : > { %v1258_v9 = vadd.f32 %v3290_v30, %v1190_v12 }
 0x1d9   : > { %v3794_v61 = vpop.f32.mrf.mxu1 }
 0x1da   : > { %v1322_v34 = vmax.f32 %v1258_v9, 0.0  ;;  %2763 = vmatpush.xpose.msk.msrb.mxu2 %vm1958_vm1, %v1893_v36 }
 0x1db   : > { %v1075_v49 = vpop.f32.mrf.mxu0  ;;  %2682 = vmatmul.msk.f32.gmra.mxu2 %vm809_vm0, %v478_v27  ;;  %595 = vrot.lane.b32.xlu0 %v3353_v21, %s3080_s21 }
 0x1dc   : > { %v1076_v57 = vadd.f32 %v3278_v25, %v1075_v49  ;;  %2724 = vmatmul.msk.f32.gmra.mxu1 %vm809_vm0, %v1322_v34  ;;  %v480_v34 = vld [vmem:[%s3214_s18 + $0x1f8] sm:$0xff] }
 0x1dd   : > { %671 = vrot.lane.b32.xlu1 %v480_v34, %s3080_s21 }
 0x1de   : > { %v1191_v23 = vmul.f32 %v3283_v26, %v1076_v57  ;;  %2764 = vmatpush.xpose.msk.msrb.mxu2 %vm1958_vm1, %v1892_v58 }
 0x1df   : > { %635 = vrot.lane.b32.xlu2 %v3563_v41, %s3080_s21  ;;  %v3840_v41 = vld [vmem:[%s3214_s18 + $0x40] sm:$0xff] }
 0x1e0   : > { %v1259_v51 = vadd.f32 %v3290_v30, %v1191_v23  ;;  %v1096_v23 = vpop.f32.mrf.mxu2 }
 0x1e1   : > { %v3805_v18 = vpop.f32.mrf.mxu1 }
 0x1e2   : > { %v1323_v62 = vmax.f32 %v1259_v51, 0.0 }
 0x1e3   : > { %v1078_v22 = vpop.f32.mrf.mxu0  ;;  %2683 = vmatmul.msk.f32.gmra.mxu2 %vm809_vm0, %v479_v8  ;;  %561 = vrot.lane.b32.xlu0 %v3840_v41, %s3080_s21 }
 0x1e4   : > { %v1079_v32 = vadd.f32 %v3278_v25, %v1078_v22  ;;  %2725 = vmatmul.msk.f32.gmra.mxu1 %vm809_vm0, %v1323_v62 }
 0x1e5   : > { %637 = vrot.lane.b32.xlu1 %v3577_v60, %s3080_s21 }
 0x1e6   : > { %v1192_v11 = vmul.f32 %v3283_v26, %v1079_v32 }
 0x1e7   : > { %597 = vrot.lane.b32.xlu2 %v3362_v33, %s3080_s21  ;;  %v3852_v33 = vld [vmem:[%s3214_s18 + $0x48] sm:$0xff] }
 0x1e8   : > { %v1260_v44 = vadd.f32 %v3290_v30, %v1192_v11  ;;  %v1099_v11 = vpop.f32.mrf.mxu2 }
 0x1e9   : > { %v3816_v46 = vpop.f32.mrf.mxu1 }
 0x1ea   : > { %v1324_v12 = vmax.f32 %v1260_v44, 0.0 }
 0x1eb   : > { %v1081_v9 = vpop.f32.mrf.mxu0  ;;  %2684 = vmatmul.msk.f32.gmra.mxu2 %vm809_vm0, %v480_v34  ;;  %661 = vrot.lane.b32.xlu0 %v3750_v6, %s3080_s21 }
 0x1ec   : > { %v1082_v36 = vadd.f32 %v3278_v25, %v1081_v9  ;;  %2726 = vmatmul.msk.f32.gmra.mxu1 %vm809_vm0, %v1324_v12 }
 0x1ed   : > { %599 = vrot.lane.b32.xlu1 %v3371_v39, %s3080_s21 }
 0x1ee   : > { %v1193_v42 = vmul.f32 %v3283_v26, %v1082_v36 }
 0x1ef   : > { %563 = vrot.lane.b32.xlu2 %v3852_v33, %s3080_s21 }
 0x1f0   : > { %v1261_v49 = vadd.f32 %v3290_v30, %v1193_v42  ;;  %v1102_v42 = vpop.f32.mrf.mxu2 }
 0x1f1   : > { %v3829_v15 = vpop.f32.mrf.mxu1 }
 0x1f2   : > { %v1325_v57 = vmax.f32 %v1261_v49, 0.0  ;;  %v3863_v49 = vld [vmem:[%s3214_s18 + $0x50] sm:$0xff] }
 0x1f3   : > { %v1084_v58 = vpop.f32.mrf.mxu0  ;;  %627 = vrot.lane.b32.xlu0 %v3506_v38, %s3080_s21 }
 0x1f4   : > { %v1085_v27 = vadd.f32 %v3278_v25, %v1084_v58  ;;  %2727 = vmatmul.msk.f32.gmra.mxu1 %vm809_vm0, %v1325_v57 }
 0x1f5   : > { %565 = vrot.lane.b32.xlu1 %v3863_v49, %s3080_s21 }
 0x1f6   : > { %v1194_v51 = vmul.f32 %v3283_v26, %v1085_v27 }
 0x1f7   : > { %663 = vrot.lane.b32.xlu2 %v3771_v53, %s3080_s21 }
 0x1f8   : > { %v1262_v21 = vadd.f32 %v3290_v30, %v1194_v51  ;;  %v1105_v27 = vpop.f32.mrf.mxu2 }
 0x1f9   : > { %v3844_v62 = vpop.f32.mrf.mxu1 }
 0x1fa   : > { %v1326_v22 = vmax.f32 %v1262_v21, 0.0 }
 0x1fb   : > { %v1087_v32 = vpop.f32.mrf.mxu0  ;;  %589 = vrot.lane.b32.xlu0 %v3326_v1, %s3080_s21 }
 0x1fc   : > { %v1088_v8 = vadd.f32 %v3278_v25, %v1087_v32  ;;  %2728 = vmatmul.msk.f32.gmra.mxu1 %vm809_vm0, %v1326_v22 }
 0x1fd   : > { %665 = vrot.lane.b32.xlu1 %v3788_v19, %s3080_s21 }
 0x1fe   : > { %v1195_v60 = vmul.f32 %v3283_v26, %v1088_v8 }
 0x1ff   : > { %629 = vrot.lane.b32.xlu2 %v3517_v50, %s3080_s21 }
 0x200   : > { %v1263_v44 = vadd.f32 %v3290_v30, %v1195_v60  ;;  %v1108_v60 = vpop.f32.mrf.mxu2 }
 0x201   : > { %v1648_v12 = vpop.f32.mrf.mxu1 }
 0x202   : > { %v1327_v9 = vmax.f32 %v1263_v44, 0.0 }
 0x203   : > { %v1090_v36 = vpop.f32.mrf.mxu0 }
 0x204   : > { %v1091_v34 = vadd.f32 %v3278_v25, %v1090_v36  ;;  %2729 = vmatmul.msk.f32.gmra.mxu1 %vm809_vm0, %v1327_v9  ;;  %v3909_v36 = vld [vmem:[%s3214_s18 + $0x28] sm:$0xff] }
 0x205   : > { %631 = vrot.lane.b32.xlu1 %v3533_v0, %s3080_s21  ;;  %555 = vrot.lane.b32.xlu0 %v3909_v36, %s3080_s21 }
 0x206   : > { %v1196_v39 = vmul.f32 %v3283_v26, %v1091_v34  ;;  %v3875_v26 = vld [vmem:[%s4716_s2] ss:$0 sm:$0xff] }
 0x207   : > { %v1097_v53 = vadd.f32 %v3875_v26, %v1096_v23  ;;  %v3894_v23 = vld [vmem:[%s4718_s4] ss:$0 sm:$0xff]  ;;  %v1100_v19 = vadd.f32 %v3875_v26, %v1099_v11  ;;  %591 = vrot.lane.b32.xlu2 %v3335_v7, %s3080_s21 }
 0x208   : > { %v1264_v6 = vadd.f32 %v3290_v30, %v1196_v39  ;;  %v3883_v30 = vld [vmem:[%s4717_s3] ss:$0 sm:$0xff] }
 0x209   : > { %v1651_v57 = vpop.f32.mrf.mxu1  ;;  %v1198_v21 = vmul.f32 %v3883_v30, %v1097_v53  ;;  %v1199_v44 = vmul.f32 %v3883_v30, %v1100_v19  ;;  %v1649_v53 = vadd.f32 %v3595_v31, %v1648_v12 }
 0x20a   : > { %v1328_v58 = vmax.f32 %v1264_v6, 0.0  ;;  %v3915_v6 = vpop.f32.mrf.mxu2  ;;  %v1652_v0 = vadd.f32 %v3595_v31, %v1651_v57 }
 0x20b   : > { %v1093_v25 = vpop.f32.mrf.mxu0  ;;  %v1266_v50 = vadd.f32 %v3894_v23, %v1198_v21  ;;  %v1267_v39 = vadd.f32 %v3894_v23, %v1199_v44  ;;  %v3927_v21 = vld [vmem:[%s3214_s18 + $0x30] sm:$0xff]  ;;  %v1788_v12 = vmul.f32 %v3608_v54, %v1649_v53 }
 0x20c   : > { %v1094_v51 = vadd.f32 %v3875_v26, %v1093_v25  ;;  %2730 = vmatmul.msk.f32.vlgmr.msra.gmra.mxu3 %vm809_vm0, %v1328_v58  ;;  %v1103_v25 = vadd.f32 %v3875_v26, %v1102_v42  ;;  %v1789_v57 = vmul.f32 %v3608_v54, %v1652_v0 }
 0x20d   : > { %v1330_v1 = vmax.f32 %v1266_v50, 0.0  ;;  %593 = vrot.lane.b32.xlu1 %v3344_v13, %s3080_s21  ;;  %655 = vrot.lane.b32.xlu0 %v3683_v14, %s3080_s21  ;;  %v1646_v13 = vadd.f32 %v3595_v31, %v3844_v62  ;;  %v1106_v50 = vadd.f32 %v3875_v26, %v1105_v27  ;;  %v1643_v14 = vadd.f32 %v3595_v31, %v3829_v15  ;;  %v3949_v62 = vld [vmem:[%s3214_s18 + $0x38] sm:$0xff] }
 0x20e   : > { %v1197_v38 = vmul.f32 %v3883_v30, %v1094_v51  ;;  %v1857_v19 = vadd.f32 %v3619_v20, %v1789_v57  ;;  %v1640_v15 = vadd.f32 %v3595_v31, %v3816_v46 }
 0x20f   : > { %557 = vrot.lane.b32.xlu2 %v3927_v21, %s3080_s21  ;;  %v1201_v27 = vmul.f32 %v3883_v30, %v1106_v50  ;;  %v1786_v0 = vmul.f32 %v3608_v54, %v1643_v14  ;;  %v4002_v50 = vld [vmem:[%s3214_s18 + $0xa0] sm:$0xff] }
 0x210   : > { %v1265_v22 = vadd.f32 %v3894_v23, %v1197_v38  ;;  %v1331_v38 = vmax.f32 %v1267_v39, 0.0  ;;  %v1856_v39 = vadd.f32 %v3619_v20, %v1788_v12  ;;  %v1785_v46 = vmul.f32 %v3608_v54, %v1640_v15  ;;  %4738 = vst [vmem:[#allocation7_spill] sm:$0xff] %v4002_v50 }
 0x211   : > { %v1654_v32 = vpop.f32.mrf.mxu1 }
 0x212   : > { %v1329_v8 = vmax.f32 %v1265_v22, 0.0  ;;  %v1655_v9 = vadd.f32 %v3595_v31, %v1654_v32  ;;  %v1200_v32 = vmul.f32 %v3883_v30, %v1103_v25  ;;  %v1109_v25 = vadd.f32 %v3875_v26, %v1108_v60 }
 0x214   : > { %2731 = vmatmul.msk.f32.gmra.mxu3 %vm809_vm0, %v1329_v8  ;;  %v1790_v7 = vmul.f32 %v3608_v54, %v1655_v9  ;;  %v1268_v44 = vadd.f32 %v3894_v23, %v1200_v32  ;;  %v1202_v57 = vmul.f32 %v3883_v30, %v1109_v25  ;;  %v3980_v32 = vld [vmem:[%s3214_s18 + $0x98] sm:$0xff] }
 0x215   : > { %559 = vrot.lane.b32.xlu1 %v3949_v62, %s3080_s21  ;;  %621 = vrot.lane.b32.xlu0 %v3473_v2, %s3080_s21  ;;  %v1637_v2 = vadd.f32 %v3595_v31, %v3805_v18  ;;  %4737 = vst [vmem:[#allocation6_spill] sm:$0xff] %v3980_v32 }
 0x216   : > { %v1858_v42 = vadd.f32 %v3619_v20, %v1790_v7  ;;  %v1270_v12 = vadd.f32 %v3894_v23, %v1202_v57 }
 0x217   : > { %657 = vrot.lane.b32.xlu2 %v3706_v59, %s3080_s21  ;;  %v1920_v59 = vmax.f32 %v1856_v39, 0.0  ;;  %v1784_v18 = vmul.f32 %v3608_v54, %v1637_v2 }
 0x218   : > { %v1922_v8 = vmax.f32 %v1858_v42, 0.0  ;;  %v1853_v42 = vadd.f32 %v3619_v20, %v1785_v46  ;;  %v1334_v14 = vmax.f32 %v1270_v12, 0.0 }
 0x219   : > { %v1657_v11 = vpop.f32.mrf.mxu1 }
 0x21a   : > { %v1658_v34 = vadd.f32 %v3595_v31, %v1657_v11  ;;  %v1921_v11 = vmax.f32 %v1857_v19, 0.0 }
 0x21c   : > { %v1791_v58 = vmul.f32 %v3608_v54, %v1658_v34  ;;  %2732 = vmatmul.msk.f32.gmra.mxu3 %vm809_vm0, %v1330_v1  ;;  %v1787_v1 = vmul.f32 %v3608_v54, %v1646_v13  ;;  %v1332_v34 = vmax.f32 %v1268_v44, 0.0  ;;  %v1112_v13 = vadd.f32 %v3875_v26, %v3915_v6 }
 0x21d   : > { %659 = vrot.lane.b32.xlu1 %v3729_v17, %s3080_s21  ;;  %583 = vrot.lane.b32.xlu0 %v3980_v32, %s3080_s21  ;;  %v1634_v17 = vadd.f32 %v3595_v31, %v3794_v61  ;;  %v1631_v61 = vadd.f32 %v3595_v31, %v3778_v3  ;;  %v1917_v6 = vmax.f32 %v1853_v42, 0.0 }
 0x21e   : > { %v1859_v51 = vadd.f32 %v3619_v20, %v1791_v58  ;;  %v1114_v9 = vpop.f32.mrf.mxu2  ;;  %v1855_v58 = vadd.f32 %v3619_v20, %v1787_v1  ;;  %v1203_v44 = vmul.f32 %v3883_v30, %v1112_v13  ;;  %v1852_v1 = vadd.f32 %v3619_v20, %v1784_v18 }
 0x21f   : > { %623 = vrot.lane.b32.xlu2 %v3484_v10, %s3080_s21  ;;  %v1783_v19 = vmul.f32 %v3608_v54, %v1634_v17  ;;  %v1115_v15 = vadd.f32 %v3875_v26, %v1114_v9 }
 0x220   : > { %v1923_v22 = vmax.f32 %v1859_v51, 0.0  ;;  %v1269_v51 = vadd.f32 %v3894_v23, %v1201_v27  ;;  %v1782_v27 = vmul.f32 %v3608_v54, %v1631_v61 }
 0x221   : > { %v3963_v7 = vpop.f32.mrf.mxu1  ;;  %v1851_v39 = vadd.f32 %v3619_v20, %v1783_v19  ;;  %v1204_v2 = vmul.f32 %v3883_v30, %v1115_v15  ;;  %v1616_v19 = vadd.f32 %v3595_v31, %v3665_v63  ;;  %v4085_v15 = vld [vmem:[%s3214_s18 + $0x80] sm:$0xff] }
 0x222   : > { %2766 = vmatpush.xpose.msk.msrb.mxu3 %vm1958_vm1, %v1923_v22  ;;  %v1333_v60 = vmax.f32 %v1269_v51, 0.0  ;;  %v1854_v22 = vadd.f32 %v3619_v20, %v1786_v0  ;;  %v1271_v0 = vadd.f32 %v3894_v23, %v1203_v44  ;;  %v4033_v51 = vld [vmem:[%s3214_s18 + $0x18] sm:$0xff]  ;;  %4740 = vst [vmem:[#allocation9_spill] sm:$0xff] %v4085_v15 }
 0x223   : > { %v1915_v9 = vmax.f32 %v1851_v39, 0.0  ;;  %v1777_v63 = vmul.f32 %v3608_v54, %v1616_v19 }
 0x224   : > { %2733 = vmatmul.msk.f32.gmra.mxu3 %vm809_vm0, %v1331_v38  ;;  %v1919_v38 = vmax.f32 %v1855_v58, 0.0  ;;  %v1918_v10 = vmax.f32 %v1854_v22, 0.0  ;;  %v1335_v46 = vmax.f32 %v1271_v0, 0.0 }
 0x225   : > { %625 = vrot.lane.b32.xlu1 %v3495_v28, %s3080_s21  ;;  %v1628_v28 = vadd.f32 %v3595_v31, %v3757_v52  ;;  %v4028_v52 = vld [vmem:[%s3214_s18 + $0xa8] sm:$0xff]  ;;  %v1845_v0 = vadd.f32 %v3619_v20, %v1777_v63 }
 0x226   : > { %2767 = vmatpush.xpose.msk.msrb.mxu3 %vm1958_vm1, %v1922_v8  ;;  %v1117_v53 = vpop.f32.mrf.mxu2  ;;  %4739 = vst [vmem:[#allocation8_spill] sm:$0xff] %v4028_v52 }
 0x227   : > { %585 = vrot.lane.b32.xlu2 %v4002_v50, %s3080_s21  ;;  %v1781_v58 = vmul.f32 %v3608_v54, %v1628_v28  ;;  %v1118_v18 = vadd.f32 %v3875_v26, %v1117_v53  ;;  %v1613_v28 = vadd.f32 %v3595_v31, %v3638_v24 }
 0x229   : > { %v3993_v8 = vpop.f32.mrf.mxu1  ;;  %v1849_v17 = vadd.f32 %v3619_v20, %v1781_v58  ;;  %v1205_v53 = vmul.f32 %v3883_v30, %v1118_v18  ;;  %v1776_v24 = vmul.f32 %v3608_v54, %v1613_v28  ;;  %v4153_v28 = vld [vmem:[%s3214_s18 + $0x100] sm:$0xff] }
 0x22a   : > { %2768 = vmatpush.xpose.msk.msrb.mxu3 %vm1958_vm1, %v1921_v11  ;;  %v4009_v11 = vld [vmem:[%s3214_s18 + $0x10] sm:$0xff] }
 0x22b   : > { %549 = vrot.lane.b32.xlu0 %v4009_v11, %s3080_s21  ;;  %v1913_v13 = vmax.f32 %v1849_v17, 0.0 }
 0x22c   : > { %2734 = vmatmul.msk.f32.gmra.mxu3 %vm809_vm0, %v1332_v34  ;;  %v1916_v34 = vmax.f32 %v1852_v1, 0.0  ;;  %v1273_v1 = vadd.f32 %v3894_v23, %v1205_v53 }
 0x22d   : > { %587 = vrot.lane.b32.xlu1 %v4028_v52, %s3080_s21 }
 0x22e   : > { %2769 = vmatpush.xpose.msk.msrb.mxu3 %vm1958_vm1, %v1920_v59  ;;  %v1120_v3 = vpop.f32.mrf.mxu2  ;;  %v1625_v59 = vadd.f32 %v3595_v31, %v3736_v16  ;;  %v1850_v16 = vadd.f32 %v3619_v20, %v1782_v27 }
 0x22f   : > { %551 = vrot.lane.b32.xlu2 %v4033_v51, %s3080_s21 }
 0x230   : > { %v1780_v57 = vmul.f32 %v3608_v54, %v1625_v59  ;;  %v1914_v22 = vmax.f32 %v1850_v16, 0.0 }
 0x231   : > { %v4025_v25 = vpop.f32.mrf.mxu1 }
 0x232   : > { %2770 = vmatpush.xpose.msk.msrb.mxu3 %vm1958_vm1, %v1919_v38  ;;  %v1622_v38 = vadd.f32 %v3595_v31, %v3713_v45  ;;  %v4054_v45 = vld [vmem:[%s3214_s18 + $0x20] sm:$0xff]  ;;  %v1848_v61 = vadd.f32 %v3619_v20, %v1780_v57  ;;  %v1844_v57 = vadd.f32 %v3619_v20, %v1776_v24 }
 0x233   : > { %649 = vrot.lane.b32.xlu0 %v3599_v37, %s3080_s21  ;;  %v1619_v37 = vadd.f32 %v3595_v31, %v3690_v55 }
 0x234   : > { %2735 = vmatmul.msk.f32.gmra.mxu3 %vm809_vm0, %v1333_v60  ;;  %v1779_v42 = vmul.f32 %v3608_v54, %v1622_v38 }
 0x235   : > { %553 = vrot.lane.b32.xlu1 %v4054_v45, %s3080_s21 }
 0x236   : > { %2771 = vmatpush.xpose.msk.msrb.mxu3 %vm1958_vm1, %v1918_v10  ;;  %v1123_v60 = vpop.f32.mrf.mxu2  ;;  %v1272_v10 = vadd.f32 %v3894_v23, %v1204_v2  ;;  %v1847_v44 = vadd.f32 %v3619_v20, %v1779_v42  ;;  %v4101_v2 = vld [vmem:[%s3214_s18 + $0x88] sm:$0xff] }
 0x237   : > { %651 = vrot.lane.b32.xlu2 %v3631_v43, %s3080_s21  ;;  %v1912_v43 = vmax.f32 %v1848_v61, 0.0  ;;  %v1124_v59 = vadd.f32 %v3875_v26, %v1123_v60  ;;  %4741 = vst [vmem:[#allocation10_spill] sm:$0xff] %v4101_v2  ;;  %v4108_v60 = vld [vmem:[%s3214_s18 + $0x108] sm:$0xff] }
 0x238   : > { %v1336_v12 = vmax.f32 %v1272_v10, 0.0  ;;  %v1911_v27 = vmax.f32 %v1847_v44, 0.0  ;;  %v4120_v10 = vld [vmem:[%s3214_s18 + $0x90] sm:$0xff] }
 0x239   : > { %v4064_v55 = vpop.f32.mrf.mxu1  ;;  %v1207_v16 = vmul.f32 %v3883_v30, %v1124_v59  ;;  %4742 = vst [vmem:[#allocation11_spill] sm:$0xff] %v4120_v10 }
 0x23a   : > { %2772 = vmatpush.xpose.msk.msrb.mxu3 %vm1958_vm1, %v1917_v6  ;;  %v1778_v6 = vmul.f32 %v3608_v54, %v1619_v37  ;;  %v4125_v37 = vld [vmem:[%s3214_s18] sm:$0xff] }
 0x23b   : > { %615 = vrot.lane.b32.xlu0 %v3440_v40, %s3080_s21  ;;  %v1275_v17 = vadd.f32 %v3894_v23, %v1207_v16 }
 0x23c   : > { %2736 = vmatmul.msk.f32.gmra.mxu3 %vm809_vm0, %v1334_v14  ;;  %v1121_v14 = vadd.f32 %v3875_v26, %v1120_v3  ;;  %v1337_v3 = vmax.f32 %v1273_v1, 0.0  ;;  %v1846_v39 = vadd.f32 %v3619_v20, %v1778_v6  ;;  %v4138_v6 = vld [vmem:[%s3214_s18 + $0x8] sm:$0xff] }
 0x23d   : > { %653 = vrot.lane.b32.xlu1 %v3658_v35, %s3080_s21 }
 0x23e   : > { %2773 = vmatpush.xpose.msk.msrb.mxu3 %vm1958_vm1, %v1916_v34  ;;  %v1126_v40 = vpop.f32.mrf.mxu2  ;;  %v1206_v34 = vmul.f32 %v3883_v30, %v1121_v14 }
 0x23f   : > { %617 = vrot.lane.b32.xlu2 %v3451_v48, %s3080_s21  ;;  %v1910_v48 = vmax.f32 %v1846_v39, 0.0 }
 0x240   : > { %v1274_v58 = vadd.f32 %v3894_v23, %v1206_v34  ;;  %v4160_v34 = vpop.permute.xlu1 %573 }
 0x241   : > { %v4091_v35 = vpop.f32.mrf.mxu1 }
 0x242   : > { %2774 = vmatpush.xpose.msk.msrb.mxu3 %vm1958_vm1, %v1915_v9  ;;  %v1338_v38 = vmax.f32 %v1274_v58, 0.0 }
 0x243   : > { %577 = vrot.lane.b32.xlu0 %v4085_v15, %s3080_s21 }
 0x244   : > { %2737 = vmatmul.msk.f32.gmra.mxu3 %vm809_vm0, %v1335_v46  ;;  %v1909_v46 = vmax.f32 %v1845_v0, 0.0  ;;  %v4170_v0 = vld [vmem:[%s3214_s18 + $0x110] sm:$0xff] }
 0x245   : > { %619 = vrot.lane.b32.xlu1 %v3462_v56, %s3080_s21  ;;  %v1908_v56 = vmax.f32 %v1844_v57, 0.0 }
 0x246   : > { %2775 = vmatpush.xpose.msk.msrb.mxu3 %vm1958_vm1, %v1914_v22  ;;  %v1129_v9 = vpop.f32.mrf.mxu2  ;;  %v1127_v22 = vadd.f32 %v3875_v26, %v1126_v40  ;;  %v4148_v40 = vpop.permute.xlu2 %571 }
 0x247   : > { %579 = vrot.lane.b32.xlu2 %v4101_v2, %s3080_s21 }
 0x248   : > { %v1208_v42 = vmul.f32 %v3883_v30, %v1127_v22 }
 0x249   : > { %v4116_v18 = vpop.f32.mrf.mxu1 }
 0x24a   : > { %2776 = vmatpush.xpose.msk.msrb.mxu3 %vm1958_vm1, %v1913_v13  ;;  %v1339_v13 = vmax.f32 %v1275_v17, 0.0  ;;  %v1276_v61 = vadd.f32 %v3894_v23, %v1208_v42 }
 0x24b   : > { %611 = vrot.lane.b32.xlu0 %v4108_v60, %s3080_s21 }
 0x24c   : > { %2738 = vmatmul.msk.f32.gmra.mxu3 %vm809_vm0, %v1336_v12  ;;  %v1130_v12 = vadd.f32 %v3875_v26, %v1129_v9  ;;  %v4175_v9 = vpop.permute.xlu1 %605 }
 0x24d   : > { %581 = vrot.lane.b32.xlu1 %v4120_v10, %s3080_s21 }
 0x24e   : > { %2777 = vmatpush.xpose.msk.msrb.mxu3 %vm1958_vm1, %v1912_v43  ;;  %v1132_v53 = vpop.f32.mrf.mxu2  ;;  %v1340_v43 = vmax.f32 %v1276_v61, 0.0 }
 0x24f   : > { %545 = vrot.lane.b32.xlu2 %v4125_v37, %s3080_s21  ;;  %v1133_v14 = vadd.f32 %v3875_v26, %v1132_v53 }
 0x251   : > { %v4135_v19 = vpop.f32.mrf.mxu1 }
 0x252   : > { %2778 = vmatpush.xpose.msk.msrb.mxu3 %vm1958_vm1, %v1911_v27 }
 0x253   : > { %641 = vrot.lane.b32.xlu0 %v3541_v5, %s3080_s21  ;;  %v1209_v5 = vmul.f32 %v3883_v30, %v1130_v12 }
 0x254   : > { %2739 = vmatmul.msk.f32.gmra.mxu3 %vm809_vm0, %v1337_v3 }
 0x255   : > { %547 = vrot.lane.b32.xlu1 %v4138_v6, %s3080_s21  ;;  %v1277_v1 = vadd.f32 %v3894_v23, %v1209_v5 }
 0x256   : > { %2779 = vmatpush.xpose.msk.msrb.mxu3 %vm1958_vm1, %v1910_v48  ;;  %v1135_v44 = vpop.f32.mrf.mxu2  ;;  %v4167_v48 = vpop.permute.xlu2 %603 }
 0x257   : > { %645 = vrot.lane.b32.xlu2 %v3571_v47, %s3080_s21  ;;  %v1210_v47 = vmul.f32 %v3883_v30, %v1133_v14  ;;  %v1341_v63 = vmax.f32 %v1277_v1, 0.0  ;;  %v1136_v3 = vadd.f32 %v3875_v26, %v1135_v44 }
 0x259   : > { %v4158_v27 = vpop.f32.mrf.mxu1  ;;  %v1278_v39 = vadd.f32 %v3894_v23, %v1210_v47  ;;  %v1211_v59 = vmul.f32 %v3883_v30, %v1136_v3 }
 0x25a   : > { %2780 = vmatpush.xpose.msk.msrb.mxu3 %vm1958_vm1, %v1909_v46 }
 0x25b   : > { %v1342_v58 = vmax.f32 %v1278_v39, 0.0 }
 0x25c   : > { %2740 = vmatmul.msk.f32.gmra.mxu3 %vm809_vm0, %v1338_v38  ;;  %v1279_v38 = vadd.f32 %v3894_v23, %v1211_v59 }
 0x25d   : > { %647 = vrot.lane.b32.xlu1 %v3585_v4, %s3080_s21  ;;  %v4165_v4 = vpop.permute.xlu0 %575 }
 0x25e   : > { %2781 = vmatpush.xpose.msk.msrb.mxu3 %vm1958_vm1, %v1908_v56  ;;  %v1138_v24 = vpop.f32.mrf.mxu2  ;;  %v4184_v56 = vpop.permute.xlu2 %569  ;;  %v1343_v42 = vmax.f32 %v1279_v38, 0.0 }
 0x25f   : > { %609 = vrot.lane.b32.xlu2 %v4153_v28, %s3080_s21  ;;  %v1139_v16 = vadd.f32 %v3875_v26, %v1138_v24 }
 0x261   : > { %v4177_v46 = vpop.f32.mrf.mxu1  ;;  %v1212_v17 = vmul.f32 %v3883_v30, %v1139_v16 }
 0x263   : > { %v1280_v12 = vadd.f32 %v3894_v23, %v1212_v17 }
 0x264   : > { %2741 = vmatmul.msk.f32.gmra.mxu3 %vm809_vm0, %v1339_v13  ;;  %v4189_v13 = vpop.permute.xlu1 %671 }
 0x265   : > { %613 = vrot.lane.b32.xlu1 %v4170_v0, %s3080_s21  ;;  %v4182_v57 = vpop.permute.xlu0 %607  ;;  %4743 = vst [vmem:[#allocation12_spill] sm:$0xff] %v4189_v13  ;;  %v1344_v14 = vmax.f32 %v1280_v12, 0.0 }
 0x266   : > { %v1141_v22 = vpop.f32.mrf.mxu2 }
 0x267   : > { %v1142_v53 = vadd.f32 %v3875_v26, %v1141_v22 }
 0x269   : > { %v1687_v61 = vpop.f32.mrf.mxu1  ;;  %v1213_v44 = vmul.f32 %v3883_v30, %v1142_v53 }
 0x26c   : > { %2742 = vmatmul.msk.f32.gmra.mxu3 %vm809_vm0, %v1340_v43  ;;  %v4196_v43 = vpop.permute.xlu2 %669  ;;  %v4199_v1 = vpop.permute.xlu1 %637 }
 0x26d   : > { %643 = vrot.lane.b32.xlu1 %v3557_v29, %s3080_s21  ;;  %v4194_v5 = vpop.permute.xlu0 %639  ;;  %4744 = vst [vmem:[#allocation13_spill] sm:$0xff] %v4196_v43  ;;  %s2886_s21 = sshll.u32 %s3171_s11, 2  ;;  %s2540_s11 = scalar_lea.sflag [#allocation4], %s407_s20 }
 0x26e   : > { %v1144_v29 = vpop.f32.mrf.mxu2  ;;  %s2550_s29 = scalar_lea.hbm %s4726_s12, %s2886_s21 }
 0x26f   : > { %v1145_v47 = vadd.f32 %v3875_v26, %v1144_v29  ;;  %s2554_s17 = sshll.u32 %s2550_s29, 4  ;;  %s2555_s17 = int_to_ptr.hbm [resolvable:$true] %s2554_s17 }
 0x270   : > { %s3030_s19 = sshra.s32 %s2555_s17, 4  ;;  %s3031_s19 = int_to_ptr.hbm [resolvable:$true] %s3030_s19 }
 0x271   : > { %v1690_v39 = vpop.f32.mrf.mxu1  ;;  %v1214_v59 = vmul.f32 %v3883_v30, %v1145_v47  ;;  %s3032_s21 = scalar_lea.hbm %s3031_s19, 4  ;;  %p3037_p0 = scmp.lt.s32.totalorder %s3031_s19, %s4726_s12 }
 0x272   : > { %p3033_p11 = scmp.ne.s32.totalorder %s3031_s19, %s3032_s21  ;;  %p3038_p1 = scmp.lt.s32.totalorder %s3036_s27, %s3032_s21 }
 0x273   : > { %v1282_v38 = vadd.f32 %v3894_v23, %v1214_v59 }
 0x274   : > { %2743 = vmatmul.msk.f32.gmra.mxu3 %vm809_vm0, %v1341_v63  ;;  %v1281_v63 = vadd.f32 %v3894_v23, %v1213_v44  ;;  %v4204_v3 = vpop.permute.xlu2 %635  ;;  %v4211_v22 = vpop.permute.xlu1 %599  ;;  %p3034_p12 = pnand %p3033_p11, %p3188_p5  ;;  %p3039_p2 = por %p3038_p1, %p3037_p0 }
 0x275   : > { %v4207_v16 = vpop.permute.xlu0 %601 }
 0x276   : > { %p3035_p13 = pneg %p3034_p12 }
 0x278   : > { %p3040_p3 = pnand %p3039_p2, %p3035_p13 }
 0x279   : > { %v1693_v53 = vpop.f32.mrf.mxu1 }
 0x27c   : > { %2744 = vmatmul.msk.f32.gmra.mxu3 %vm809_vm0, %v1342_v58  ;;  %v1345_v58 = vmax.f32 %v1281_v63, 0.0  ;;  %v4213_v26 = vpop.permute.xlu2 %597  ;;  %v4219_v44 = vpop.permute.xlu1 %565 }
 0x27d   : > { %v4215_v12 = vpop.permute.xlu0 %567 }
 0x284   : > { %2745 = vmatmul.msk.f32.gmra.mxu3 %vm809_vm0, %v1343_v42  ;;  %v1346_v42 = vmax.f32 %v1282_v38, 0.0  ;;  %v4225_v59 = vpop.permute.xlu2 %563 }
 0x285   : > { %v4228_v43 = vpop.permute.xlu0 %667 }
 0x286   : > { %4745 = vst [vmem:[#allocation14_spill] sm:$0xff] %v4228_v43 }
 0x28c   : > { %2746 = vmatmul.msk.f32.gmra.mxu3 %vm809_vm0, %v1344_v14 }
 0x28f   : > { %v1699_v24 = vpop.f32.mrf.mxu3 }
 0x290   : > { %v1700_v23 = vadd.f32 %v3595_v31, %v1699_v24  ;;  %v4236_v24 = vpop.permute.xlu1 %665 }
 0x291   : > { %4746 = vst [vmem:[#allocation15_spill] sm:$0xff] %v4236_v24 }
 0x294   : > { %2747 = vmatmul.msk.f32.gmra.mxu3 %vm809_vm0, %v1345_v58  ;;  %v1696_v58 = vpop.f32.mrf.mxu1 }
 0x297   : > { %v1702_v17 = vpop.f32.mrf.mxu3 }
 0x298   : > { %v1703_v30 = vadd.f32 %v3595_v31, %v1702_v17  ;;  %v1697_v17 = vadd.f32 %v3595_v31, %v1696_v58 }
 0x29a   : > { %v1806_v47 = vmul.f32 %v3608_v54, %v1703_v30  ;;  %v4241_v30 = vld [vmem:[%s4720_s6] ss:$0 sm:$0xff] }
 0x29b   : > { %v1691_v58 = vadd.f32 %v4241_v30, %v1690_v39 }
 0x29c   : > { %2748 = vmatmul.msk.f32.gmra.mxu3 %vm809_vm0, %v1346_v42  ;;  %v1805_v42 = vmul.f32 %v3608_v54, %v1700_v23  ;;  %v1874_v13 = vadd.f32 %v3619_v20, %v1806_v47  ;;  %v4247_v47 = vpop.permute.xlu2 %663 }
 0x29d   : > { %4747 = vst [vmem:[#allocation16_spill] sm:$0xff] %v4247_v47 }
 0x29e   : > { %v1873_v23 = vadd.f32 %v3619_v20, %v1805_v42  ;;  %v4267_v42 = vld [vmem:[%s4722_s8] ss:$0 sm:$0xff] }
 0x29f   : > { %v1705_v14 = vpop.f32.mrf.mxu3 }
 0x2a0   : > { %v1706_v29 = vadd.f32 %v3595_v31, %v1705_v14  ;;  %v1804_v31 = vmul.f32 %v3608_v54, %v1697_v17  ;;  %v1937_v24 = vmax.f32 %v1873_v23, 0.0 }
 0x2a2   : > { %v1807_v63 = vmul.f32 %v3608_v54, %v1706_v29  ;;  %v1694_v29 = vadd.f32 %v4241_v30, %v1693_v53  ;;  %v1872_v53 = vadd.f32 %v3619_v20, %v1804_v31  ;;  %v4257_v54 = vpop.permute.xlu0 %633  ;;  %v1685_v31 = vadd.f32 %v4241_v30, %v4177_v46 }
 0x2a4   : > { %v1875_v38 = vadd.f32 %v3619_v20, %v1807_v63  ;;  %v1938_v63 = vmax.f32 %v1874_v13, 0.0  ;;  %v1688_v13 = vadd.f32 %v4241_v30, %v1687_v61  ;;  %v4270_v20 = vpop.permute.xlu1 %631 }
 0x2a6   : > { %v1939_v14 = vmax.f32 %v1875_v38, 0.0  ;;  %v4253_v38 = vld [vmem:[%s4721_s7] ss:$0 sm:$0xff] }
 0x2a7   : > { %v4233_v15 = vpop.f32.mrf.mxu3  ;;  %v1802_v39 = vmul.f32 %v4253_v38, %v1691_v58  ;;  %v4277_v58 = vpop.permute.xlu2 %629 }
 0x2a8   : > { %2783 = vmatpush.xpose.msk.msra.mxu2 %vm1958_vm1, %v1939_v14  ;;  %v1803_v14 = vmul.f32 %v4253_v38, %v1694_v29 }
 0x2a9   : > { %v1870_v61 = vadd.f32 %v4267_v42, %v1802_v39  ;;  %v1679_v39 = vadd.f32 %v4241_v30, %v4135_v19 }
 0x2aa   : > { %v1871_v29 = vadd.f32 %v4267_v42, %v1803_v14  ;;  %v4282_v14 = vpop.permute.xlu0 %595 }
 0x2ab   : > { %v1934_v43 = vmax.f32 %v1870_v61, 0.0 }
 0x2ac   : > { %2784 = vmatpush.xpose.msk.msra.mxu2 %vm1958_vm1, %v1938_v63  ;;  %v1936_v63 = vmax.f32 %v1872_v53, 0.0  ;;  %v1935_v23 = vmax.f32 %v1871_v29, 0.0  ;;  %v1682_v53 = vadd.f32 %v4241_v30, %v4158_v27 }
 0x2ae   : > { %v1799_v29 = vmul.f32 %v4253_v38, %v1682_v53  ;;  %v4310_v53 = vld [vmem:[%s4724_s10] sm:$0x1] }
 0x2af   : > { %v4259_v17 = vpop.f32.mrf.mxu3  ;;  %v4298_v27 = vpop.permute.xlu2 %591  ;;  %2765 = vmatmul.msk.f32.vlgmr.msrb.gmra.mxu2 %vm1958_vm1, %v4310_v53  ;;  %2782 = vmatmul.msk.f32.vlgmr.msrb.gmra.mxu3 %vm1958_vm1, %v4310_v53 }
 0x2b0   : > { %2785 = vmatpush.xpose.msk.msra.mxu2 %vm1958_vm1, %v1937_v24  ;;  %v1801_v24 = vmul.f32 %v4253_v38, %v1688_v13  ;;  %v4289_v13 = vpop.permute.xlu1 %593  ;;  %4748 = vst [vmem:[#allocation17_spill] sm:$0xff] %v4298_v27 }
 0x2b2   : > { %v1869_v46 = vadd.f32 %v4267_v42, %v1801_v24  ;;  %v1867_v24 = vadd.f32 %v4267_v42, %v1799_v29  ;;  %v4304_v19 = vpop.permute.xlu0 %561 }
 0x2b4   : > { %2786 = vmatpush.xpose.msk.msra.mxu2 %vm1958_vm1, %v1936_v63  ;;  %v1800_v63 = vmul.f32 %v4253_v38, %v1685_v31  ;;  %v1933_v2 = vmax.f32 %v1869_v46, 0.0  ;;  %v1676_v31 = vadd.f32 %v4241_v30, %v4116_v18  ;;  %v1931_v46 = vmax.f32 %v1867_v24, 0.0 }
 0x2b6   : > { %v1797_v18 = vmul.f32 %v4253_v38, %v1676_v31 }
 0x2b7   : > { %v4279_v47 = vpop.f32.mrf.mxu3 }
 0x2b8   : > { %2787 = vmatpush.xpose.msk.msra.mxu2 %vm1958_vm1, %v1935_v23  ;;  %v1868_v23 = vadd.f32 %v4267_v42, %v1800_v63  ;;  %v1865_v32 = vadd.f32 %v4267_v42, %v1797_v18  ;;  %v1664_v18 = vadd.f32 %v4241_v30, %v3993_v8 }
 0x2ba   : > { %v1932_v61 = vmax.f32 %v1868_v23, 0.0  ;;  %v1670_v23 = vadd.f32 %v4241_v30, %v4064_v55  ;;  %v4332_v31 = vpop.permute.xlu0 %661  ;;  %v1929_v52 = vmax.f32 %v1865_v32, 0.0  ;;  %v1661_v32 = vadd.f32 %v4241_v30, %v3963_v7 }
 0x2bb   : > { %4749 = vst [vmem:[#allocation18_spill] sm:$0xff] %v4332_v31 }
 0x2bc   : > { %2788 = vmatpush.xpose.msk.msra.mxu2 %vm1958_vm1, %v1934_v43  ;;  %v1798_v43 = vmul.f32 %v4253_v38, %v1679_v39  ;;  %v4320_v39 = vpop.permute.xlu1 %559  ;;  %v1795_v24 = vmul.f32 %v4253_v38, %v1670_v23  ;;  %v1793_v23 = vmul.f32 %v4253_v38, %v1664_v18 }
 0x2be   : > { %v1866_v63 = vadd.f32 %v4267_v42, %v1798_v43  ;;  %v1667_v43 = vadd.f32 %v4241_v30, %v4025_v25 }
 0x2bf   : > { %v4295_v10 = vpop.f32.mrf.mxu3 }
 0x2c0   : > { %2789 = vmatpush.xpose.msk.msra.mxu2 %vm1958_vm1, %v1933_v2  ;;  %v1673_v2 = vadd.f32 %v4241_v30, %v4091_v35  ;;  %v1930_v50 = vmax.f32 %v1866_v63, 0.0  ;;  %v4329_v35 = vpop.permute.xlu2 %557  ;;  %v1863_v63 = vadd.f32 %v4267_v42, %v1795_v24 }
 0x2c4   : > { %2790 = vmatpush.xpose.msk.msra.mxu2 %vm1958_vm1, %v1932_v61  ;;  %v1796_v61 = vmul.f32 %v4253_v38, %v1673_v2  ;;  %v4341_v2 = vpop.permute.xlu1 %659 }
 0x2c5   : > { %4750 = vst [vmem:[#allocation19_spill] sm:$0xff] %v4341_v2  ;;  %v4354_v2 = vpop.permute.xlu0 %627 }
 0x2c7   : > { %v4322_v29 = vpop.f32.mrf.mxu3 }
 0x2c8   : > { %2791 = vmatpush.xpose.msk.msra.mxu2 %vm1958_vm1, %v1931_v46  ;;  %v1864_v46 = vadd.f32 %v4267_v42, %v1796_v61  ;;  %v4348_v25 = vpop.permute.xlu2 %657  ;;  %v1927_v61 = vmax.f32 %v1863_v63, 0.0 }
 0x2c9   : > { %4751 = vst [vmem:[#allocation20_spill] sm:$0xff] %v4348_v25 }
 0x2ca   : > { %v1928_v31 = vmax.f32 %v1864_v46, 0.0 }
 0x2cc   : > { %2792 = vmatpush.xpose.msk.msra.mxu2 %vm1958_vm1, %v1930_v50  ;;  %v1794_v50 = vmul.f32 %v4253_v38, %v1667_v43  ;;  %v1792_v43 = vmul.f32 %v4253_v38, %v1661_v32  ;;  %v4361_v46 = vpop.permute.xlu1 %625  ;;  %v2972_v32 = vld [vmem:[%s3214_s18 + $0x78] sm:$0xff] }
 0x2ce   : > { %v1860_v7 = vadd.f32 %v4267_v42, %v1792_v43  ;;  %v2973_v43 = vld [vmem:[%s3214_s18 + $0x70] sm:$0xff] }
 0x2cf   : > { %v4338_v55 = vpop.f32.mrf.mxu3 }
 0x2d0   : > { %2793 = vmatpush.xpose.msk.msra.mxu2 %vm1958_vm1, %v1929_v52  ;;  %v1862_v52 = vadd.f32 %v4267_v42, %v1794_v50  ;;  %v4365_v50 = vpop.permute.xlu2 %623 }
 0x2d2   : > { %v1926_v24 = vmax.f32 %v1862_v52, 0.0  ;;  %v1924_v52 = vmax.f32 %v1860_v7, 0.0 }
 0x2d4   : > { %2794 = vmatpush.xpose.msk.msra.mxu2 %vm1958_vm1, %v1928_v31  ;;  %v1861_v31 = vadd.f32 %v4267_v42, %v1793_v23  ;;  %v752_v23 = vmul.f32 %v2972_v32, %v4165_v4  ;;  %v2975_v32 = vld [vmem:[%s3214_s18 + $0x60] sm:$0xff] }
 0x2d6   : > { %v1925_v18 = vmax.f32 %v1861_v31, 0.0  ;;  %v751_v31 = vmul.f32 %v2973_v43, %v4160_v34  ;;  %v2976_v43 = vld [vmem:[%s3214_s18 + $0x58] sm:$0xff] }
 0x2d7   : > { %v4356_v8 = vpop.f32.mrf.mxu3 }
 0x2d8   : > { %2795 = vmatpush.xpose.msk.msra.mxu2 %vm1958_vm1, %v1927_v61  ;;  %v4370_v61 = vpop.permute.xlu0 %589 }
 0x2d9   : > { %4752 = vst [vmem:[#allocation21_spill] sm:$0xff] %v4370_v61  ;;  %v2974_v61 = vld [vmem:[%s3214_s18 + $0x68] sm:$0xff] }
 0x2da   : > { %v750_v4 = vmul.f32 %v2974_v61, %v4148_v40  ;;  %v747_v40 = vmul.f32 %v3863_v49, %v4219_v44  ;;  %v744_v44 = vmul.f32 %v3949_v62, %v4320_v39 }
 0x2dc   : > { %2796 = vmatpush.xpose.msk.msra.mxu2 %vm1958_vm1, %v1926_v24  ;;  %v4375_v24 = vpop.permute.xlu1 %587 }
 0x2dd   : > { %4753 = vst [vmem:[#allocation22_spill] sm:$0xff] %v4375_v24  ;;  %v748_v24 = vmul.f32 %v2976_v43, %v4215_v12 }
 0x2df   : > { %v4367_v63 = vpop.f32.mrf.mxu3 }
 0x2e0   : > { %2797 = vmatpush.xpose.msk.msra.mxu2 %vm1958_vm1, %v1925_v18  ;;  %v4384_v18 = vpop.permute.xlu2 %585  ;;  %v556_v7 = vpop.permute.xlu0 %555 }
 0x2e1   : > { %4754 = vst [vmem:[#allocation23_spill] sm:$0xff] %v4384_v18 }
 0x2e4   : > { %2798 = vmatpush.xpose.msk.msra.mxu2 %vm1958_vm1, %v1924_v52  ;;  %v749_v52 = vmul.f32 %v2975_v32, %v4184_v56  ;;  %v554_v34 = vpop.permute.xlu1 %553 }
 0x2e5   : > { %v741_v62 = vmul.f32 %v4054_v45, %v554_v34 }
 0x2e7   : > { %v4380_v25 = vpop.f32.mrf.mxu3  ;;  %2799 = vmatmul.msk.f32.vlgmr.msra.gmra.mxu2 %vm1958_vm1, %v4310_v53 }
 0x2e8   : > { %2817 = vmatpush.xpose.msk.msrb.mxu2 %vm1958_vm1, %v752_v23  ;;  %v552_v18 = vpop.permute.xlu2 %551  ;;  %v4397_v27 = vpop.permute.xlu0 %655 }
 0x2ec   : > { %2818 = vmatpush.xpose.msk.msrb.mxu2 %vm1958_vm1, %v751_v31  ;;  %v4404_v56 = vpop.permute.xlu1 %653  ;;  %v746_v31 = vmul.f32 %v3852_v33, %v4225_v59  ;;  %v743_v33 = vmul.f32 %v3927_v21, %v4329_v35  ;;  %v740_v35 = vmul.f32 %v4033_v51, %v552_v18 }
 0x2ef   : > { %v4392_v23 = vpop.f32.mrf.mxu3 }
 0x2f0   : > { %2819 = vmatpush.xpose.msk.msrb.mxu2 %vm1958_vm1, %v750_v4  ;;  %v4409_v12 = vpop.permute.xlu2 %651  ;;  %v745_v4 = vmul.f32 %v3840_v41, %v4304_v19  ;;  %v4414_v32 = vpop.permute.xlu0 %621 }
 0x2f4   : > { %2820 = vmatpush.xpose.msk.msrb.mxu2 %vm1958_vm1, %v749_v52  ;;  %v742_v52 = vmul.f32 %v3909_v36, %v556_v7 }
 0x2f7   : > { %v4402_v61 = vpop.f32.mrf.mxu3 }
 0x2f8   : > { %2821 = vmatpush.xpose.msk.msrb.mxu2 %vm1958_vm1, %v748_v24  ;;  %v4419_v24 = vpop.permute.xlu1 %619  ;;  %v4424_v59 = vpop.permute.xlu2 %617 }
 0x2f9   : > { %v4426_v19 = vpop.permute.xlu0 %583 }
 0x2fc   : > { %2822 = vmatpush.xpose.msk.msrb.mxu2 %vm1958_vm1, %v747_v40 }
 0x2ff   : > { %v1741_v49 = vpop.f32.mrf.mxu3 }
 0x300   : > { %2823 = vmatpush.xpose.msk.msrb.mxu2 %vm1958_vm1, %v746_v31  ;;  %v4430_v43 = vpop.permute.xlu1 %581  ;;  %v4434_v21 = vpop.permute.xlu2 %579 }
 0x301   : > { %v550_v40 = vpop.permute.xlu0 %549 }
 0x302   : > { %v739_v36 = vmul.f32 %v4009_v11, %v550_v40 }
 0x304   : > { %2824 = vmatpush.xpose.msk.msrb.mxu2 %vm1958_vm1, %v745_v4 }
 0x307   : > { %v1744_v41 = vpop.f32.mrf.mxu3 }
 0x308   : > { %2825 = vmatpush.xpose.msk.msrb.mxu2 %vm1958_vm1, %v744_v44  ;;  %v548_v7 = vpop.permute.xlu1 %547  ;;  %v546_v34 = vpop.permute.xlu2 %545  ;;  %v2977_v44 = vld [vmem:[%s3214_s18 + $0x178] sm:$0xff] }
 0x309   : > { %v738_v45 = vmul.f32 %v4138_v6, %v548_v7  ;;  %v737_v51 = vmul.f32 %v4125_v37, %v546_v34  ;;  %v1745_v7 = vadd.f32 %v4241_v30, %v1744_v41 }
 0x30c   : > { %2826 = vmatpush.xpose.msk.msrb.mxu2 %vm1958_vm1, %v743_v33  ;;  %v784_v33 = vmul.f32 %v2977_v44, %v4194_v5 }
 0x30f   : > { %v1747_v39 = vpop.f32.mrf.mxu3 }
 0x310   : > { %2827 = vmatpush.xpose.msk.msrb.mxu2 %vm1958_vm1, %v742_v52  ;;  %v2978_v52 = vld [vmem:[%s3214_s18 + $0x170] sm:$0xff] }
 0x311   : > { %v783_v6 = vmul.f32 %v2978_v52, %v4199_v1  ;;  %v2982_v52 = vld [vmem:[%s3214_s18 + $0x150] sm:$0xff] }
 0x314   : > { %2828 = vmatpush.xpose.msk.msrb.mxu2 %vm1958_vm1, %v741_v62  ;;  %v1748_v62 = vadd.f32 %v4241_v30, %v1747_v39  ;;  %v2980_v39 = vld [vmem:[%s3214_s18 + $0x160] sm:$0xff] }
 0x315   : > { %v781_v34 = vmul.f32 %v2980_v39, %v4257_v54  ;;  %v2985_v39 = vld [vmem:[%s3214_s18 + $0x138] sm:$0xff] }
 0x317   : > { %v1750_v31 = vpop.f32.mrf.mxu3 }
 0x318   : > { %2829 = vmatpush.xpose.msk.msrb.mxu2 %vm1958_vm1, %v740_v35  ;;  %v1751_v18 = vadd.f32 %v4241_v30, %v1750_v31  ;;  %v1821_v31 = vmul.f32 %v4253_v38, %v1748_v62  ;;  %v1736_v62 = vadd.f32 %v4241_v30, %v4392_v23 }
 0x31a   : > { %v1822_v35 = vmul.f32 %v4253_v38, %v1751_v18  ;;  %v1820_v18 = vmul.f32 %v4253_v38, %v1745_v7  ;;  %v2984_v7 = vld [vmem:[%s3214_s18 + $0x140] sm:$0xff] }
 0x31c   : > { %2830 = vmatpush.xpose.msk.msrb.mxu2 %vm1958_vm1, %v739_v36  ;;  %v2979_v36 = vld [vmem:[%s3214_s18 + $0x168] sm:$0xff]  ;;  %v1890_v1 = vadd.f32 %v4267_v42, %v1822_v35 }
 0x31d   : > { %v782_v5 = vmul.f32 %v2979_v36, %v4204_v3  ;;  %v1889_v3 = vadd.f32 %v4267_v42, %v1821_v31  ;;  %v1733_v36 = vadd.f32 %v4241_v30, %v4380_v25  ;;  %v777_v31 = vmul.f32 %v2984_v7, %v4361_v46 }
 0x31e   : > { %v1954_v41 = vmax.f32 %v1890_v1, 0.0  ;;  %v1730_v1 = vadd.f32 %v4241_v30, %v4367_v63  ;;  %v1709_v7 = vadd.f32 %v4241_v30, %v4233_v15 }
 0x31f   : > { %v1753_v4 = vpop.f32.mrf.mxu3 }
 0x320   : > { %2831 = vmatpush.xpose.msk.msrb.mxu2 %vm1958_vm1, %v738_v45  ;;  %v1754_v11 = vadd.f32 %v4241_v30, %v1753_v4  ;;  %v2981_v4 = vld [vmem:[%s3214_s18 + $0x158] sm:$0xff]  ;;  %v1815_v46 = vmul.f32 %v4253_v38, %v1730_v1 }
 0x321   : > { %v780_v44 = vmul.f32 %v2981_v4, %v4270_v20 }
 0x322   : > { %v1823_v37 = vmul.f32 %v4253_v38, %v1754_v11  ;;  %v1953_v11 = vmax.f32 %v1889_v3, 0.0  ;;  %v1724_v3 = vadd.f32 %v4241_v30, %v4338_v55  ;;  %v1721_v55 = vadd.f32 %v4241_v30, %v4322_v29 }
 0x324   : > { %2832 = vmatpush.xpose.msk.msrb.mxu2 %vm1958_vm1, %v737_v51  ;;  %v1891_v40 = vadd.f32 %v4267_v42, %v1823_v37  ;;  %v1742_v51 = vadd.f32 %v4241_v30, %v1741_v49  ;;  %v1888_v49 = vadd.f32 %v4267_v42, %v1820_v18  ;;  %v2983_v37 = vld [vmem:[%s3214_s18 + $0x148] sm:$0xff]  ;;  %v1812_v29 = vmul.f32 %v4253_v38, %v1721_v55 }
 0x326   : > { %v1955_v45 = vmax.f32 %v1891_v40, 0.0  ;;  %v1819_v54 = vmul.f32 %v4253_v38, %v1742_v51  ;;  %v1952_v35 = vmax.f32 %v1888_v49, 0.0  ;;  %v778_v40 = vmul.f32 %v2983_v37, %v4354_v2 }
 0x327   : > { %v1816_v2 = vmul.f32 %v4253_v38, %v1733_v36  ;;  %v1727_v51 = vadd.f32 %v4241_v30, %v4356_v8  ;;  %v1712_v36 = vadd.f32 %v4241_v30, %v4259_v17 }
 0x328   : > { %2851 = vmatpush.xpose.msk.msra.mxu2 %vm1958_vm1, %v784_v33  ;;  %2800 = vmatpush.xpose.msk.msra.mxu3 %vm1958_vm1, %v1955_v45  ;;  %v1739_v33 = vadd.f32 %v4241_v30, %v4402_v61  ;;  %v1887_v61 = vadd.f32 %v4267_v42, %v1819_v54  ;;  %v1813_v54 = vmul.f32 %v4253_v38, %v1724_v3  ;;  %v2991_v3 = vld [vmem:[%s3214_s18 + $0xf0] sm:$0xff] }
 0x329   : > { %v1884_v63 = vadd.f32 %v4267_v42, %v1816_v2  ;;  %v1808_v2 = vmul.f32 %v4253_v38, %v1709_v7  ;;  %v4764_v7 = vld [vmem:[#allocation9_spill] sm:$0xff] }
 0x32a   : > { %v1818_v20 = vmul.f32 %v4253_v38, %v1739_v33  ;;  %v4521_v33 = vld [vmem:[%s4723_s9] sm:$0x1] }
 0x32b   : > { %v1948_v4 = vmax.f32 %v1884_v63, 0.0  ;;  %2833 = vmatmul.msk.f32.vlgmr.msrb.gmra.mxu2 %vm1958_vm1, %v4521_v33  ;;  %v1876_v15 = vadd.f32 %v4267_v42, %v1808_v2  ;;  %v2990_v63 = vld [vmem:[%s3214_s18 + $0x118] sm:$0xff] }
 0x32c   : > { %2852 = vmatpush.xpose.msk.msra.mxu2 %vm1958_vm1, %v783_v6  ;;  %2801 = vmatpush.xpose.msk.msra.mxu3 %vm1958_vm1, %v1954_v41  ;;  %v779_v6 = vmul.f32 %v2982_v52, %v4277_v58  ;;  %v1817_v58 = vmul.f32 %v4253_v38, %v1736_v62  ;;  %v1886_v23 = vadd.f32 %v4267_v42, %v1818_v20 }
 0x32d   : > { %v1814_v41 = vmul.f32 %v4253_v38, %v1727_v51  ;;  %v1881_v62 = vadd.f32 %v4267_v42, %v1813_v54  ;;  %v2989_v51 = vld [vmem:[%s3214_s18 + $0xf8] sm:$0xff] }
 0x32e   : > { %v1885_v45 = vadd.f32 %v4267_v42, %v1817_v58  ;;  %v1950_v25 = vmax.f32 %v1886_v23, 0.0  ;;  %v2994_v54 = vld [vmem:[%s3214_s18 + $0xd8] sm:$0xff] }
 0x330   : > { %2853 = vmatpush.xpose.msk.msra.mxu2 %vm1958_vm1, %v782_v5  ;;  %2802 = vmatpush.xpose.msk.msra.mxu3 %vm1958_vm1, %v1953_v11  ;;  %v1951_v5 = vmax.f32 %v1887_v61, 0.0  ;;  %v1949_v18 = vmax.f32 %v1885_v45, 0.0  ;;  %v2987_v11 = vld [vmem:[%s3214_s18 + $0x128] sm:$0xff]  ;;  %v2988_v61 = vld [vmem:[%s3214_s18 + $0x120] sm:$0xff] }
 0x331   : > { %v774_v52 = vmul.f32 %v2987_v11, %v4419_v24  ;;  %v1715_v24 = vadd.f32 %v4241_v30, %v4279_v47  ;;  %v2509_v47 = vld [vmem:[#allocation2] sm:$0x1] }
 0x334   : > { %2854 = vmatpush.xpose.msk.msra.mxu2 %vm1958_vm1, %v781_v34  ;;  %2803 = vmatpush.xpose.msk.msra.mxu3 %vm1958_vm1, %v1952_v35  ;;  %v776_v34 = vmul.f32 %v2985_v39, %v4365_v50  ;;  %v1883_v50 = vadd.f32 %v4267_v42, %v1815_v46  ;;  %v773_v35 = vmul.f32 %v2988_v61, %v4424_v59  ;;  %v4560_v39 = vpop.permute.xlu0 %649 }
 0x335   : > { %v1810_v59 = vmul.f32 %v4253_v38, %v1715_v24  ;;  %v768_v46 = vmul.f32 %v2989_v51, %v4182_v57  ;;  %v4575_v57 = vpop.permute.xlu1 %647  ;;  %v4758_v24 = vld [vmem:[#allocation8_spill] sm:$0xff] }
 0x336   : > { %v1947_v49 = vmax.f32 %v1883_v50, 0.0 }
 0x337   : > { %v1878_v1 = vadd.f32 %v4267_v42, %v1810_v59 }
 0x338   : > { %2855 = vmatpush.xpose.msk.msra.mxu2 %vm1958_vm1, %v780_v44  ;;  %2804 = vmatpush.xpose.msk.msra.mxu3 %vm1958_vm1, %v1951_v5  ;;  %v2986_v44 = vld [vmem:[%s3214_s18 + $0x130] sm:$0xff]  ;;  %v3081_v5 = vmov 0  }
 0x339   : > { %v775_v8 = vmul.f32 %v2986_v44, %v4414_v32  ;;  %v1882_v32 = vadd.f32 %v4267_v42, %v1814_v41  ;;  %2938 = vset.pattern.permute.xlu1 %v3081_v5  ;;  %2939 = vset.pattern.permute.xlu0 %v3081_v5  ;;  %v2992_v41 = vld [vmem:[%s3214_s18 + $0xe8] sm:$0xff]  ;;  %v2993_v44 = vld [vmem:[%s3214_s18 + $0xe0] sm:$0xff] }
 0x33a   : > { %2512 = vperm.xlu1 %2938, %v2509_v47   ;;  %v766_v50 = vmul.f32 %v2992_v41, %v4167_v48  ;;  %v4763_v5 = vld [vmem:[#allocation10_spill] sm:$0xff] }
 0x33b   : > { %v1946_v20 = vmax.f32 %v1882_v32, 0.0  ;;  %v764_v32 = vmul.f32 %v2994_v54, %v4211_v22  ;;  %v2996_v22 = vld [vmem:[%s3214_s18 + $0xc8] sm:$0xff]  ;;  %v754_v47 = vmul.f32 %v4763_v5, %v4434_v21 }
 0x33c   : > { %2856 = vmatpush.xpose.msk.msra.mxu2 %vm1958_vm1, %v779_v6  ;;  %2805 = vmatpush.xpose.msk.msra.mxu3 %vm1958_vm1, %v1950_v25  ;;  %v1718_v6 = vadd.f32 %v4241_v30, %v4295_v10  ;;  %v1945_v10 = vmax.f32 %v1881_v62, 0.0  ;;  %v1942_v25 = vmax.f32 %v1878_v1, 0.0  ;;  %v4755_v62 = vld [vmem:[#allocation17_spill] sm:$0xff]  ;;  %v3000_v1 = vld [vmem:[%s3214_s18 + $0x1f8] sm:$0xff] }
 0x33d   : > { %v3002_v21 = vld [vmem:[%s3214_s18 + $0x1e8] sm:$0xff] }
 0x33e   : > { %v1811_v37 = vmul.f32 %v4253_v38, %v1718_v6  ;;  %v762_v6 = vmul.f32 %v2996_v22, %v4282_v14  ;;  %v4756_v14 = vld [vmem:[#allocation21_spill] sm:$0xff]  ;;  %v3013_v22 = vld [vmem:[%s3214_s18 + $0x190] sm:$0xff] }
 0x33f   : > { %v3006_v41 = vld [vmem:[%s3214_s18 + $0x1c8] sm:$0xff] }
 0x340   : > { %2857 = vmatpush.xpose.msk.msra.mxu2 %vm1958_vm1, %v778_v40  ;;  %2806 = vmatpush.xpose.msk.msra.mxu3 %vm1958_vm1, %v1949_v18  ;;  %v1880_v40 = vadd.f32 %v4267_v42, %v1812_v29  ;;  %v1879_v58 = vadd.f32 %v4267_v42, %v1811_v37  ;;  %v2997_v29 = vld [vmem:[%s3214_s18 + $0xc0] sm:$0xff]  ;;  %v4759_v37 = vld [vmem:[#allocation23_spill] sm:$0xff] }
 0x342   : > { %v1944_v23 = vmax.f32 %v1880_v40, 0.0  ;;  %v1943_v17 = vmax.f32 %v1879_v58, 0.0  ;;  %v4760_v40 = vld [vmem:[#allocation7_spill] sm:$0xff] }
 0x343   : > { %v4762_v58 = vld [vmem:[#allocation11_spill] sm:$0xff] }
 0x344   : > { %2858 = vmatpush.xpose.msk.msra.mxu2 %vm1958_vm1, %v777_v31  ;;  %2807 = vmatpush.xpose.msk.msra.mxu3 %vm1958_vm1, %v1948_v4  ;;  %v1809_v31 = vmul.f32 %v4253_v38, %v1712_v36  ;;  %v616_v38 = vpop.permute.xlu0 %615  ;;  %v4761_v36 = vld [vmem:[#allocation6_spill] sm:$0xff] }
 0x345   : > { %v772_v18 = vmul.f32 %v2990_v63, %v616_v38  ;;  %v756_v59 = vmul.f32 %v4761_v36, %v4426_v19  ;;  %v3001_v19 = vld [vmem:[%s3214_s18 + $0x1f0] sm:$0xff]  ;;  %v4769_v38 = vld [vmem:[#allocation16_spill] sm:$0xff] }
 0x346   : > { %v1877_v45 = vadd.f32 %v4267_v42, %v1809_v31  ;;  %v767_v42 = vmul.f32 %v2991_v3, %v4175_v9  ;;  %v614_v9 = vpop.permute.xlu1 %613  ;;  %v4770_v3 = vld [vmem:[#allocation18_spill] sm:$0xff] }
 0x347   : > { %v771_v55 = vmul.f32 %v4170_v0, %v614_v9 }
 0x348   : > { %2859 = vmatpush.xpose.msk.msra.mxu2 %vm1958_vm1, %v776_v34  ;;  %2808 = vmatpush.xpose.msk.msra.mxu3 %vm1958_vm1, %v1947_v49  ;;  %v1941_v30 = vmax.f32 %v1877_v45, 0.0  ;;  %v1940_v34 = vmax.f32 %v1876_v15, 0.0  ;;  %v2995_v49 = vld [vmem:[%s3214_s18 + $0xd0] sm:$0xff] }
 0x349   : > { %v763_v11 = vmul.f32 %v2995_v49, %v4213_v26  ;;  %v2998_v26 = vld [vmem:[%s3214_s18 + $0xb8] sm:$0xff] }
 0x34c   : > { %2860 = vmatpush.xpose.msk.msra.mxu2 %vm1958_vm1, %v775_v8  ;;  %2809 = vmatpush.xpose.msk.msra.mxu3 %vm1958_vm1, %v1946_v20  ;;  %v578_v4 = vpop.permute.xlu0 %577  ;;  %v765_v8 = vmul.f32 %v2993_v44, %v4207_v16  ;;  %v760_v20 = vmul.f32 %v2998_v26, %v4755_v62  ;;  %v3007_v44 = vld [vmem:[%s3214_s18 + $0x1c0] sm:$0xff] }
 0x34d   : > { %v753_v31 = vmul.f32 %v4764_v7, %v578_v4 }
 0x350   : > { %2861 = vmatpush.xpose.msk.msra.mxu2 %vm1958_vm1, %v774_v52  ;;  %2810 = vmatpush.xpose.msk.msra.mxu3 %vm1958_vm1, %v1945_v10  ;;  %v757_v10 = vmul.f32 %v4760_v40, %v4759_v37 }
 0x354   : > { %2862 = vmatpush.xpose.msk.msra.mxu2 %vm1958_vm1, %v773_v35  ;;  %2811 = vmatpush.xpose.msk.msra.mxu3 %vm1958_vm1, %v1944_v23  ;;  %v612_v48 = vpop.permute.xlu0 %611  ;;  %v4757_v35 = vld [vmem:[#allocation22_spill] sm:$0xff]  ;;  %v755_v23 = vmul.f32 %v4762_v58, %v4430_v43  ;;  %v4766_v43 = vld [vmem:[#allocation13_spill] sm:$0xff]  ;;  %v2534_v58 = vlaneseq }
 0x355   : > { %v770_v16 = vmul.f32 %v4108_v60, %v612_v48  ;;  %v761_v60 = vmul.f32 %v2997_v29, %v4289_v13  ;;  %v758_v13 = vmul.f32 %v4758_v24, %v4757_v35  ;;  %v799_v45 = vmul.f32 %v3001_v19, %v4766_v43 }
 0x356   : > { %vm2536_vm5 = vcmp.lt.s32.totalorder %v2534_v58, 512 }
 0x358   : > { %2812 = vmatpush.xpose.msk.msra.mxu3 %vm1958_vm1, %v1943_v17  ;;  %2863 = vmatpush.xpose.msk.msra.mxu2 %vm1958_vm1, %v772_v18  ;;  %v4765_v17 = vld [vmem:[#allocation12_spill] sm:$0xff]  ;;  %v3005_v18 = vld [vmem:[%s3214_s18 + $0x1d0] sm:$0xff] }
 0x359   : > { %v800_v2 = vmul.f32 %v3000_v1, %v4765_v17 }
 0x35c   : > { %2813 = vmatpush.xpose.msk.msra.mxu3 %vm1958_vm1, %v1942_v25  ;;  %2864 = vmatpush.xpose.msk.msra.mxu2 %vm1958_vm1, %v771_v55  ;;  %v4767_v25 = vld [vmem:[#allocation14_spill] sm:$0xff]  ;;  %v3008_v55 = vld [vmem:[%s3214_s18 + $0x1b8] sm:$0xff] }
 0x35d   : > { %v798_v15 = vmul.f32 %v3002_v21, %v4767_v25  ;;  %v792_v54 = vmul.f32 %v3008_v55, %v4397_v27  ;;  %v3012_v27 = vld [vmem:[%s3214_s18 + $0x198] sm:$0xff] }
 0x360   : > { %2814 = vmatpush.xpose.msk.msra.mxu3 %vm1958_vm1, %v1941_v30  ;;  %2865 = vmatpush.xpose.msk.msra.mxu2 %vm1958_vm1, %v770_v16  ;;  %v3003_v30 = vld [vmem:[%s3214_s18 + $0x1e0] sm:$0xff]  ;;  %v3010_v16 = vld [vmem:[%s3214_s18 + $0x1a8] sm:$0xff] }
 0x361   : > { %v790_v49 = vmul.f32 %v3010_v16, %v4409_v12  ;;  %v3014_v12 = vld [vmem:[%s3214_s18 + $0x188] sm:$0xff] }
 0x364   : > { %2815 = vmatpush.xpose.msk.msra.mxu3 %vm1958_vm1, %v1940_v34  ;;  %v4768_v34 = vld [vmem:[#allocation15_spill] sm:$0xff] }
 0x365   : > { %v797_v51 = vmul.f32 %v3003_v30, %v4768_v34 }
 0x367   : > { %2816 = vmatmul.msk.f32.vlgmr.msra.gmra.mxu3 %vm1958_vm1, %v4310_v53  ;;  %v4583_v53 = vpop.permute.xlu2 %645 }
 0x368   : > { %2834 = vmatpush.xpose.msk.msrb.mxu3 %vm1958_vm1, %v768_v46  ;;  %v3004_v46 = vld [vmem:[%s3214_s18 + $0x1d8] sm:$0xff] }
 0x369   : > { %v796_v63 = vmul.f32 %v3004_v46, %v4769_v38 }
 0x36c   : > { %2835 = vmatpush.xpose.msk.msrb.mxu3 %vm1958_vm1, %v767_v42  ;;  %v795_v42 = vmul.f32 %v3005_v18, %v4770_v3 }
 0x36f   : > { %v610_v0 = vpop.permute.xlu2 %609 }
 0x370   : > { %2836 = vmatpush.xpose.msk.msrb.mxu3 %vm1958_vm1, %v766_v50  ;;  %v769_v52 = vmul.f32 %v4153_v28, %v610_v0  ;;  %v2999_v28 = vld [vmem:[%s3214_s18 + $0xb0] sm:$0xff] }
 0x371   : > { %v759_v61 = vmul.f32 %v2999_v28, %v4756_v14  ;;  %v4771_v50 = vld [vmem:[#allocation19_spill] sm:$0xff] }
 0x372   : > { %2866 = vmatpush.xpose.msk.msra.mxu2 %vm1958_vm1, %v769_v52  ;;  %v794_v4 = vmul.f32 %v3006_v41, %v4771_v50  ;;  %v788_v52 = vmul.f32 %v3012_v27, %v4575_v57  ;;  %v2171_v57 = vpop.f32.mrf.mxu2 }
 0x374   : > { %2837 = vmatpush.xpose.msk.msrb.mxu3 %vm1958_vm1, %v765_v8  ;;  %v4772_v8 = vld [vmem:[#allocation20_spill] sm:$0xff] }
 0x375   : > { %2867 = vmatmul.msk.f32.vlgmr.msra.gmra.mxu2 %vm1958_vm1, %v4521_v33  ;;  %v793_v9 = vmul.f32 %v3007_v44, %v4772_v8 }
 0x378   : > { %2838 = vmatpush.xpose.msk.msrb.mxu3 %vm1958_vm1, %v764_v32  ;;  %v3009_v32 = vld [vmem:[%s3214_s18 + $0x1b0] sm:$0xff] }
 0x379   : > { %v791_v48 = vmul.f32 %v3009_v32, %v4404_v56  ;;  %v644_v56 = vpop.permute.xlu1 %643 }
 0x37a   : > { %v786_v29 = vmul.f32 %v3014_v12, %v644_v56  ;;  %v2211_v62 = vpop.f32.mrf.mxu2 }
 0x37c   : > { %2839 = vmatpush.xpose.msk.msrb.mxu3 %vm1958_vm1, %v763_v11  ;;  %v3011_v11 = vld [vmem:[%s3214_s18 + $0x1a0] sm:$0xff] }
 0x37d   : > { %v789_v0 = vmul.f32 %v3011_v11, %v4560_v39  ;;  %v3015_v39 = vld [vmem:[%s3214_s18 + $0x180] sm:$0xff]  ;;  %s2618_s18 = sshll.u32 %s407_s20, 2 }
 0x37e   : > { %s409_s30 = scalar_lea.vmem [#allocation3], %s2618_s18 }
 0x37f   : > { %s2552_s16 = sshll.u32 %s409_s30, 4  ;;  %s2553_s16 = int_to_ptr.vmem [resolvable:$true] %s2552_s16 }
 0x380   : > { %2840 = vmatpush.xpose.msk.msrb.mxu3 %vm1958_vm1, %v762_v6  ;;  %v787_v6 = vmul.f32 %v3013_v22, %v4583_v53  ;;  %v2191_v53 = vpop.f32.mrf.mxu3 }
 0x384   : > { %2841 = vmatpush.xpose.msk.msrb.mxu3 %vm1958_vm1, %v761_v60  ;;  %v642_v60 = vpop.permute.xlu0 %641 }
 0x385   : > { %v785_v26 = vmul.f32 %v3015_v39, %v642_v60 }
 0x388   : > { %2842 = vmatpush.xpose.msk.msrb.mxu3 %vm1958_vm1, %v760_v20 }
 0x38c   : > { %2843 = vmatpush.xpose.msk.msrb.mxu3 %vm1958_vm1, %v759_v61 }
 0x390   : > { %2844 = vmatpush.xpose.msk.msrb.mxu3 %vm1958_vm1, %v758_v13 }
 0x394   : > { %2845 = vmatpush.xpose.msk.msrb.mxu3 %vm1958_vm1, %v757_v10 }
 0x398   : > { %2846 = vmatpush.xpose.msk.msrb.mxu3 %vm1958_vm1, %v756_v59 }
 0x39c   : > { %2847 = vmatpush.xpose.msk.msrb.mxu3 %vm1958_vm1, %v755_v23 }
 0x3a0   : > { %2848 = vmatpush.xpose.msk.msrb.mxu3 %vm1958_vm1, %v754_v47 }
 0x3a4   : > { %2849 = vmatpush.xpose.msk.msrb.mxu3 %vm1958_vm1, %v753_v31 }
 0x3a7   : > { %2850 = vmatmul.msk.f32.vlgmr.msrb.gmra.mxu3 %vm1958_vm1, %v4521_v33 }
 0x3a8   : > { %2868 = vmatpush.xpose.msk.msra.mxu3 %vm1958_vm1, %v800_v2 }
 0x3ac   : > { %2869 = vmatpush.xpose.msk.msra.mxu3 %vm1958_vm1, %v799_v45  ;;  %v2513_v61 = vpop.permute.xlu1 %2512 }
 0x3ad   : > { %v2515_v13 = vperm.slane %v2513_v61, 0 }
 0x3ae   : > { %v2446_v28 = vpop.f32.mrf.mxu2 }
 0x3af   : > { %v2447_v36 = vadd.f32 %v2446_v28, %v2171_v57 }
 0x3b0   : > { %2870 = vmatpush.xpose.msk.msra.mxu3 %vm1958_vm1, %v798_v15 }
 0x3b1   : > { %v2516_v47 = vadd.f32 %v2515_v13, %v2447_v36 }
 0x3b4   : > { %2871 = vmatpush.xpose.msk.msra.mxu3 %vm1958_vm1, %v797_v51 }
 0x3b8   : > { %2872 = vmatpush.xpose.msk.msra.mxu3 %vm1958_vm1, %v796_v63 }
 0x3bc   : > { %2873 = vmatpush.xpose.msk.msra.mxu3 %vm1958_vm1, %v795_v42 }
 0x3c0   : > { %2874 = vmatpush.xpose.msk.msra.mxu3 %vm1958_vm1, %v794_v4 }
 0x3c4   : > { %2875 = vmatpush.xpose.msk.msra.mxu3 %vm1958_vm1, %v793_v9 }
 0x3c8   : > { %2876 = vmatpush.xpose.msk.msra.mxu3 %vm1958_vm1, %v792_v54 }
 0x3cc   : > { %2877 = vmatpush.xpose.msk.msra.mxu3 %vm1958_vm1, %v791_v48 }
 0x3d0   : > { %2878 = vmatpush.xpose.msk.msra.mxu3 %vm1958_vm1, %v790_v49 }
 0x3d4   : > { %2879 = vmatpush.xpose.msk.msra.mxu3 %vm1958_vm1, %v789_v0 }
 0x3d8   : > { %2880 = vmatpush.xpose.msk.msra.mxu3 %vm1958_vm1, %v788_v52 }
 0x3dc   : > { %2881 = vmatpush.xpose.msk.msra.mxu3 %vm1958_vm1, %v787_v6 }
 0x3e0   : > { %2882 = vmatpush.xpose.msk.msra.mxu3 %vm1958_vm1, %v786_v29 }
 0x3e4   : > { %2883 = vmatpush.xpose.msk.msra.mxu3 %vm1958_vm1, %v785_v26 }
 0x3e7   : > { %2884 = vmatmul.msk.f32.vlgmr.msra.gmra.mxu3 %vm1958_vm1, %v4521_v33 }
 0x3ea   : > { %v2231_v20 = vpop.f32.mrf.mxu3 }
 0x3f8   : > { %v2486_v35 = vpop.f32.mrf.mxu2 }
 0x3f9   : > { %v2487_v37 = vadd.f32 %v2486_v35, %v2211_v62 }
 0x3fb   : > { %v2518_v59 = vadd.f32 %v2515_v13, %v2487_v37 }
 0x3fd   : > { %v2525_v7 = vrot.slane %v2518_v59, 6 }
 0x42a   : > { %v2466_v14 = vpop.f32.mrf.mxu3 }
 0x42b   : > { %v2467_v24 = vadd.f32 %v2466_v14, %v2191_v53 }
 0x42d   : > { %v2517_v40 = vadd.f32 %v2515_v13, %v2467_v24 }
 0x42f   : > { %v2524_v23 = vrot.slane %v2517_v40, 7 }
 0x431   : > { %v2528_v1 = vsel %vm2527_vm2, %v2516_v47, %v2524_v23 }
 0x46a   : > { %v2506_v10 = vpop.f32.mrf.mxu3 }
 0x46b   : > { %v2507_v33 = vadd.f32 %v2506_v10, %v2231_v20 }
 0x46d   : > { %v2519_v5 = vadd.f32 %v2515_v13, %v2507_v33 }
 0x46f   : > { %v2526_v31 = vrot.slane %v2519_v5, 5 }
 0x471   : > { %v2530_v17 = vsel %vm2529_vm3, %v2525_v7, %v2526_v31 }
 0x472   : > { %v2532_v2 = vsel %vm2531_vm4, %v2528_v1, %v2530_v17 }
 0x473   : > { %2538 = vst.msk [vmem:[%s409_s30] sm:$0xf] %vm2536_vm5, %v2532_v2 }
 0x474   : > { %3043 = shalt.err (!%p3040_p3)
}
 0x475   : > { %2897 = dma.vmem_to_hbm [thread:$0]  (%p3188_p5), %s2553_s16, 64, %s2555_s17, %s2540_s11  }
 0x476 PF: > { %p2903_p4 = scmp.ge.s32.totalorder %s3078_s26, 2  ;;  %s2566_s20 = sand.u32 1, %s3066_s23  }
 0x477   : > { %s2567_s30 = scalar_lea.sflag [#allocation4], %s2566_s20 }
 0x478   : > { %p2900_p7 = pnand %p2903_p4, %p3192_p6 }
 0x47a   : > { %p2901_p8 = pneg %p2900_p7 }
 0x47c   : > { %3061 = dma.done.wait (%p2901_p8), %s2567_s30, 64  }
 0x47d   : > { %3063 = vsyncadd (%p2901_p8), %s2567_s30, 4294967232  ;;  %p24_p9 = scmp.ge.s32.totalorder %s3175_s28, 4   ;;  %s4773_s23 = smov %s3070_s24 }
 0x47e   : > { %s4774_s24 = smov %s3074_s25  ;;  %s4775_s25 = smov %s3186_s13 }
 0x47f   : > { %s4776_s26 = smov %s3175_s28  ;;  %26 = sbr.rel (!%p24_p9) target bundleno = 6 (0x6), region = 103 }
 0x484   :  { %2573 = vsyncpa [#allocation4], 1 }
 0x485   :  { %2575 = vsyncpa [#allocation4 + $0x1], 1 }

</bundles_post_ra>
